<compile_context>
chip_gen: v7x
topology: tpu7x:2x2x1
jax: 0.10.0
libtpu: 0.0.40
codegen_flags: <defaults>
</compile_context>

<pallas_src>
import functools

import jax
import jax.numpy as jnp
from jax import lax
from jax.experimental import pallas as pl
from jax.experimental.pallas import tpu as pltpu

KSIZE = 7          # kernel_size=7 -> padding=3 (per the module's __init__)
PAD = 3
NEG_SLOPE = 0.01   # nn.LeakyReLU() default negative_slope


def _spatial_attention_kernel(w_ref, x_ref, o_ref, *, C, H, W):
    # w_ref : SMEM (2*K*K,) f32 conv weights (scalar-prefetched), layout [ic, kh, kw]
    # x_ref : VMEM (1, C, H*W) lane-dense input block for this batch element
    # o_ref : VMEM (1, C, H*W) lane-dense output block
    HW = H * W
    xv = x_ref[0]                                            # (C, HW), input dtype

    # ---- vectorized channel mean + max (one reduce each, Mosaic picks tree) --
    avg = jnp.sum(xv, axis=0, keepdims=True, dtype=jnp.float32) * (1.0 / C)
    mx = jnp.max(xv, axis=0, keepdims=True).astype(jnp.float32)       # (1, HW)

    # ---- hoisted flat-position iota and edge masks (computed exactly once) --
    pos = lax.broadcasted_iota(jnp.int32, (1, HW), 1)        # flat pixel index
    col = pos % W                                            # single modulo
    hmask, vmask = {}, {}
    for d in range(-PAD, PAD + 1):
        if d == 0:
            continue
        hmask[d] = jnp.logical_and(col + d >= 0, col + d < W)
        off = pos + d * W
        vmask[d] = jnp.logical_and(off >= 0, off < HW)

    # ---- vertically shifted, vertically zero-padded planes (6 rolls/plane) --
    # vplanes[ic][kh][p] == plane_ic at (row(p)+kh-PAD, col(p)), 0 if the row
    # is out of range.  A flat roll by dh*W is exactly a vertical image shift.
    def vshift(plane):
        shifted = []
        for kh in range(KSIZE):
            dh = kh - PAD
            if dh == 0:
                shifted.append(plane)
            else:
                r = pltpu.roll(plane, shift=(-dh * W) % HW, axis=1)
                shifted.append(jnp.where(vmask[dh], r, 0.0))
        return shifted

    vplanes = (vshift(avg), vshift(mx))

    # ---- 7x7 conv: per-kw partial sums; one horizontal roll + mask per kw,
    #      shared across both input channels and all 7 vertical taps ----------
    acc = jnp.zeros((1, HW), jnp.float32)
    for kw in range(KSIZE):
        dw = kw - PAD
        part = jnp.zeros((1, HW), jnp.float32)
        for ic in range(2):
            for kh in range(KSIZE):
                wv = w_ref[ic * KSIZE * KSIZE + kh * KSIZE + kw]   # SMEM scalar
                part = part + wv * vplanes[ic][kh]
        if dw == 0:
            acc = acc + part
        else:
            rolled = pltpu.roll(part, shift=(-dw) % HW, axis=1)
            acc = acc + jnp.where(hmask[dw], rolled, 0.0)

    # ---- LeakyReLU + spatial gating in input dtype, lane-dense store --------
    act = jnp.where(acc > 0, acc, NEG_SLOPE * acc)           # (1, HW) f32
    o_ref[0] = (x_ref[0] * act.astype(o_ref.dtype)).astype(o_ref.dtype)


def spatial_attention(x, w):
    """x: (B, C, H, W); w: (1, 2, K, K) conv weight (OIHW, no bias)."""
    B, C, H, W = x.shape
    HW = H * W
    x_flat = x.reshape(B, C, HW)                   # lane-dense view (contiguous)
    w_flat = w.reshape(-1).astype(jnp.float32)     # (2*K*K,) -> SMEM prefetch

    kernel = functools.partial(_spatial_attention_kernel, C=C, H=H, W=W)

    # VMEM budget from actual block bytes: double-buffered in + out blocks plus
    # slack for the in-kernel planes/masks; clamp to [16 MiB, 64 MiB] so the
    # request never exceeds v7x's 64 MiB physical VMEM.
    block_bytes = C * HW * x.dtype.itemsize
    plane_bytes = 40 * HW * 4
    vmem_limit = int(min(max(4 * block_bytes + plane_bytes + (2 << 20),
                             16 * 1024 * 1024),
                         64 * 1024 * 1024))

    out_flat = pl.pallas_call(
        kernel,
        out_shape=jax.ShapeDtypeStruct((B, C, HW), x.dtype),
        grid_spec=pltpu.PrefetchScalarGridSpec(
            num_scalar_prefetch=1,                 # conv weights -> SMEM
            grid=(B,),
            in_specs=[pl.BlockSpec((1, C, HW), lambda b, w_s: (b, 0, 0))],
            out_specs=pl.BlockSpec((1, C, HW), lambda b, w_s: (b, 0, 0)),
        ),
        compiler_params=pltpu.CompilerParams(
            dimension_semantics=("parallel",),     # batches independent
            vmem_limit_bytes=vmem_limit,
        ),
    )(w_flat, x_flat)
    return out_flat.reshape(B, C, H, W)


def _reference(x, w):
    """Pure-JAX reference matching the PyTorch forward."""
    avg = jnp.mean(x, axis=1, keepdims=True)
    mx = jnp.max(x, axis=1, keepdims=True)
    out = jnp.concatenate([avg, mx], axis=1)
    conv = lax.conv_general_dilated(
        out, w, window_strides=(1, 1),
        padding=[(PAD, PAD), (PAD, PAD)],
        dimension_numbers=("NCHW", "OIHW", "NCHW"),
    )
    act = jnp.where(conv > 0, conv, NEG_SLOPE * conv)
    return act * x


if __name__ == "__main__":
    key = jax.random.PRNGKey(0)
    kx, kw = jax.random.split(key)

    B, C, H, W = 2, 4, 16, 16
    x = jax.random.normal(kx, (B, C, H, W), dtype=jnp.float32)
    # Deterministic synthetic conv weight (shape from nn.Conv2d(2, 1, 7, bias=False)).
    w = jax.random.normal(kw, (1, 2, KSIZE, KSIZE), dtype=jnp.float32) * 0.1

    out = spatial_attention(x, w)
    out = jax.block_until_ready(out)

    ref = _reference(x, w)
    assert out.shape == (B, C, H, W)
    err = float(jnp.max(jnp.abs(out - ref)))
    assert jnp.allclose(out, ref, atol=1e-5, rtol=1e-5), err
    print("KERNEL_OK")
</pallas_src>

<mosaic_0001>
module attributes {stable_mosaic.version = 11 : i64} {
  func.func @_spatial_attention_kernel(%arg0: i32, %arg1: memref<98xf32, #tpu.memory_space<smem>>, %arg2: memref<1x4x256xf32, #tpu.memory_space<vmem>>, %arg3: memref<1x4x256xf32, #tpu.memory_space<vmem>>) attributes {dimension_semantics = [#tpu.dimension_semantics<parallel>], iteration_bounds = array<i64: 2>, scalar_prefetch = 1 : i64, scratch_operands = 0 : i64, tpu.core_type = #tpu.core_type<tc>, window_params = [{transform_indices = @transform_0, window_bounds = array<i64: 1, 4, 256>}, {transform_indices = @transform_1, window_bounds = array<i64: 1, 4, 256>}]} {
    %c0 = arith.constant 0 : index
    %c0_0 = arith.constant 0 : index
    %c0_1 = arith.constant 0 : index
    %0 = vector.load %arg2[%c0, %c0_0, %c0_1] : memref<1x4x256xf32, #tpu.memory_space<vmem>>, vector<1x4x256xf32>
    %1 = vector.shape_cast %0 : vector<1x4x256xf32> to vector<4x256xf32>
    %cst = arith.constant dense<0.000000e+00> : vector<256xf32>
    %2 = vector.multi_reduction <add>, %1, %cst [0] : vector<4x256xf32> to vector<256xf32>
    %3 = vector.shape_cast %2 : vector<256xf32> to vector<1x256xf32>
    %cst_2 = arith.constant 2.500000e-01 : f32
    %4 = vector.broadcast %cst_2 : f32 to vector<1x256xf32>
    %5 = arith.mulf %3, %4 : vector<1x256xf32>
    %cst_3 = arith.constant dense<0xFF800000> : vector<256xf32>
    %6 = vector.multi_reduction <maximumf>, %1, %cst_3 [0] : vector<4x256xf32> to vector<256xf32>
    %7 = vector.shape_cast %6 : vector<256xf32> to vector<1x256xf32>
    %8 = tpu.iota {dimensions = array<i32: 1>} : vector<1x256xi32>
    %c16_i32 = arith.constant 16 : i32
    %c0_i32 = arith.constant 0 : i32
    %9 = arith.cmpi eq, %c16_i32, %c0_i32 : i32
    %c1_i32 = arith.constant 1 : i32
    %10 = arith.select %9, %c1_i32, %c16_i32 : i32
    %11 = vector.broadcast %10 : i32 to vector<1x256xi32>
    %12 = arith.remsi %8, %11 : vector<1x256xi32>
    %c0_i32_4 = arith.constant 0 : i32
    %13 = vector.broadcast %c0_i32_4 : i32 to vector<1x256xi32>
    %14 = arith.cmpi ne, %12, %13 : vector<1x256xi32>
    %c0_i32_5 = arith.constant 0 : i32
    %15 = vector.broadcast %c0_i32_5 : i32 to vector<1x256xi32>
    %16 = arith.cmpi slt, %12, %15 : vector<1x256xi32>
    %c0_i32_6 = arith.constant 0 : i32
    %17 = arith.cmpi slt, %10, %c0_i32_6 : i32
    %18 = vector.broadcast %17 : i1 to vector<1x256xi1>
    %19 = vector.broadcast %18 : vector<1x256xi1> to vector<1x256xi1>
    %20 = arith.xori %16, %19 : vector<1x256xi1>
    %21 = arith.andi %20, %14 : vector<1x256xi1>
    %22 = vector.broadcast %10 : i32 to vector<1x256xi32>
    %23 = arith.addi %12, %22 : vector<1x256xi32>
    %24 = arith.select %21, %23, %12 : vector<1x256xi1>, vector<1x256xi32>
    %c-3_i32 = arith.constant -3 : i32
    %25 = vector.broadcast %c-3_i32 : i32 to vector<1x256xi32>
    %26 = arith.addi %24, %25 : vector<1x256xi32>
    %c0_i32_7 = arith.constant 0 : i32
    %27 = vector.broadcast %c0_i32_7 : i32 to vector<1x256xi32>
    %28 = arith.cmpi sge, %26, %27 : vector<1x256xi32>
    %c-3_i32_8 = arith.constant -3 : i32
    %29 = vector.broadcast %c-3_i32_8 : i32 to vector<1x256xi32>
    %30 = arith.addi %24, %29 : vector<1x256xi32>
    %c16_i32_9 = arith.constant 16 : i32
    %31 = vector.broadcast %c16_i32_9 : i32 to vector<1x256xi32>
    %32 = arith.cmpi slt, %30, %31 : vector<1x256xi32>
    %33 = arith.andi %28, %32 : vector<1x256xi1>
    %c-48_i32 = arith.constant -48 : i32
    %34 = vector.broadcast %c-48_i32 : i32 to vector<1x256xi32>
    %35 = arith.addi %8, %34 : vector<1x256xi32>
    %c0_i32_10 = arith.constant 0 : i32
    %36 = vector.broadcast %c0_i32_10 : i32 to vector<1x256xi32>
    %37 = arith.cmpi sge, %35, %36 : vector<1x256xi32>
    %c256_i32 = arith.constant 256 : i32
    %38 = vector.broadcast %c256_i32 : i32 to vector<1x256xi32>
    %39 = arith.cmpi slt, %35, %38 : vector<1x256xi32>
    %40 = arith.andi %37, %39 : vector<1x256xi1>
    %c-2_i32 = arith.constant -2 : i32
    %41 = vector.broadcast %c-2_i32 : i32 to vector<1x256xi32>
    %42 = arith.addi %24, %41 : vector<1x256xi32>
    %c0_i32_11 = arith.constant 0 : i32
    %43 = vector.broadcast %c0_i32_11 : i32 to vector<1x256xi32>
    %44 = arith.cmpi sge, %42, %43 : vector<1x256xi32>
    %c-2_i32_12 = arith.constant -2 : i32
    %45 = vector.broadcast %c-2_i32_12 : i32 to vector<1x256xi32>
    %46 = arith.addi %24, %45 : vector<1x256xi32>
    %c16_i32_13 = arith.constant 16 : i32
    %47 = vector.broadcast %c16_i32_13 : i32 to vector<1x256xi32>
    %48 = arith.cmpi slt, %46, %47 : vector<1x256xi32>
    %49 = arith.andi %44, %48 : vector<1x256xi1>
    %c-32_i32 = arith.constant -32 : i32
    %50 = vector.broadcast %c-32_i32 : i32 to vector<1x256xi32>
    %51 = arith.addi %8, %50 : vector<1x256xi32>
    %c0_i32_14 = arith.constant 0 : i32
    %52 = vector.broadcast %c0_i32_14 : i32 to vector<1x256xi32>
    %53 = arith.cmpi sge, %51, %52 : vector<1x256xi32>
    %c256_i32_15 = arith.constant 256 : i32
    %54 = vector.broadcast %c256_i32_15 : i32 to vector<1x256xi32>
    %55 = arith.cmpi slt, %51, %54 : vector<1x256xi32>
    %56 = arith.andi %53, %55 : vector<1x256xi1>
    %c-1_i32 = arith.constant -1 : i32
    %57 = vector.broadcast %c-1_i32 : i32 to vector<1x256xi32>
    %58 = arith.addi %24, %57 : vector<1x256xi32>
    %c0_i32_16 = arith.constant 0 : i32
    %59 = vector.broadcast %c0_i32_16 : i32 to vector<1x256xi32>
    %60 = arith.cmpi sge, %58, %59 : vector<1x256xi32>
    %c-1_i32_17 = arith.constant -1 : i32
    %61 = vector.broadcast %c-1_i32_17 : i32 to vector<1x256xi32>
    %62 = arith.addi %24, %61 : vector<1x256xi32>
    %c16_i32_18 = arith.constant 16 : i32
    %63 = vector.broadcast %c16_i32_18 : i32 to vector<1x256xi32>
    %64 = arith.cmpi slt, %62, %63 : vector<1x256xi32>
    %65 = arith.andi %60, %64 : vector<1x256xi1>
    %c-16_i32 = arith.constant -16 : i32
    %66 = vector.broadcast %c-16_i32 : i32 to vector<1x256xi32>
    %67 = arith.addi %8, %66 : vector<1x256xi32>
    %c0_i32_19 = arith.constant 0 : i32
    %68 = vector.broadcast %c0_i32_19 : i32 to vector<1x256xi32>
    %69 = arith.cmpi sge, %67, %68 : vector<1x256xi32>
    %c256_i32_20 = arith.constant 256 : i32
    %70 = vector.broadcast %c256_i32_20 : i32 to vector<1x256xi32>
    %71 = arith.cmpi slt, %67, %70 : vector<1x256xi32>
    %72 = arith.andi %69, %71 : vector<1x256xi1>
    %c1_i32_21 = arith.constant 1 : i32
    %73 = vector.broadcast %c1_i32_21 : i32 to vector<1x256xi32>
    %74 = arith.addi %24, %73 : vector<1x256xi32>
    %c0_i32_22 = arith.constant 0 : i32
    %75 = vector.broadcast %c0_i32_22 : i32 to vector<1x256xi32>
    %76 = arith.cmpi sge, %74, %75 : vector<1x256xi32>
    %c1_i32_23 = arith.constant 1 : i32
    %77 = vector.broadcast %c1_i32_23 : i32 to vector<1x256xi32>
    %78 = arith.addi %24, %77 : vector<1x256xi32>
    %c16_i32_24 = arith.constant 16 : i32
    %79 = vector.broadcast %c16_i32_24 : i32 to vector<1x256xi32>
    %80 = arith.cmpi slt, %78, %79 : vector<1x256xi32>
    %81 = arith.andi %76, %80 : vector<1x256xi1>
    %c16_i32_25 = arith.constant 16 : i32
    %82 = vector.broadcast %c16_i32_25 : i32 to vector<1x256xi32>
    %83 = arith.addi %8, %82 : vector<1x256xi32>
    %c0_i32_26 = arith.constant 0 : i32
    %84 = vector.broadcast %c0_i32_26 : i32 to vector<1x256xi32>
    %85 = arith.cmpi sge, %83, %84 : vector<1x256xi32>
    %c256_i32_27 = arith.constant 256 : i32
    %86 = vector.broadcast %c256_i32_27 : i32 to vector<1x256xi32>
    %87 = arith.cmpi slt, %83, %86 : vector<1x256xi32>
    %88 = arith.andi %85, %87 : vector<1x256xi1>
    %c2_i32 = arith.constant 2 : i32
    %89 = vector.broadcast %c2_i32 : i32 to vector<1x256xi32>
    %90 = arith.addi %24, %89 : vector<1x256xi32>
    %c0_i32_28 = arith.constant 0 : i32
    %91 = vector.broadcast %c0_i32_28 : i32 to vector<1x256xi32>
    %92 = arith.cmpi sge, %90, %91 : vector<1x256xi32>
    %c2_i32_29 = arith.constant 2 : i32
    %93 = vector.broadcast %c2_i32_29 : i32 to vector<1x256xi32>
    %94 = arith.addi %24, %93 : vector<1x256xi32>
    %c16_i32_30 = arith.constant 16 : i32
    %95 = vector.broadcast %c16_i32_30 : i32 to vector<1x256xi32>
    %96 = arith.cmpi slt, %94, %95 : vector<1x256xi32>
    %97 = arith.andi %92, %96 : vector<1x256xi1>
    %c32_i32 = arith.constant 32 : i32
    %98 = vector.broadcast %c32_i32 : i32 to vector<1x256xi32>
    %99 = arith.addi %8, %98 : vector<1x256xi32>
    %c0_i32_31 = arith.constant 0 : i32
    %100 = vector.broadcast %c0_i32_31 : i32 to vector<1x256xi32>
    %101 = arith.cmpi sge, %99, %100 : vector<1x256xi32>
    %c256_i32_32 = arith.constant 256 : i32
    %102 = vector.broadcast %c256_i32_32 : i32 to vector<1x256xi32>
    %103 = arith.cmpi slt, %99, %102 : vector<1x256xi32>
    %104 = arith.andi %101, %103 : vector<1x256xi1>
    %c3_i32 = arith.constant 3 : i32
    %105 = vector.broadcast %c3_i32 : i32 to vector<1x256xi32>
    %106 = arith.addi %24, %105 : vector<1x256xi32>
    %c0_i32_33 = arith.constant 0 : i32
    %107 = vector.broadcast %c0_i32_33 : i32 to vector<1x256xi32>
    %108 = arith.cmpi sge, %106, %107 : vector<1x256xi32>
    %c3_i32_34 = arith.constant 3 : i32
    %109 = vector.broadcast %c3_i32_34 : i32 to vector<1x256xi32>
    %110 = arith.addi %24, %109 : vector<1x256xi32>
    %c16_i32_35 = arith.constant 16 : i32
    %111 = vector.broadcast %c16_i32_35 : i32 to vector<1x256xi32>
    %112 = arith.cmpi slt, %110, %111 : vector<1x256xi32>
    %113 = arith.andi %108, %112 : vector<1x256xi1>
    %c48_i32 = arith.constant 48 : i32
    %114 = vector.broadcast %c48_i32 : i32 to vector<1x256xi32>
    %115 = arith.addi %8, %114 : vector<1x256xi32>
    %c0_i32_36 = arith.constant 0 : i32
    %116 = vector.broadcast %c0_i32_36 : i32 to vector<1x256xi32>
    %117 = arith.cmpi sge, %115, %116 : vector<1x256xi32>
    %c256_i32_37 = arith.constant 256 : i32
    %118 = vector.broadcast %c256_i32_37 : i32 to vector<1x256xi32>
    %119 = arith.cmpi slt, %115, %118 : vector<1x256xi32>
    %120 = arith.andi %117, %119 : vector<1x256xi1>
    %c48_i32_38 = arith.constant 48 : i32
    %121 = tpu.dynamic_rotate %5 by %c48_i32_38 dim 1 : vector<1x256xf32>, i32 -> vector<1x256xf32>
    %cst_39 = arith.constant 0.000000e+00 : f32
    %122 = vector.broadcast %cst_39 : f32 to vector<1x256xf32>
    %123 = arith.select %40, %121, %122 : vector<1x256xi1>, vector<1x256xf32>
    %c32_i32_40 = arith.constant 32 : i32
    %124 = tpu.dynamic_rotate %5 by %c32_i32_40 dim 1 : vector<1x256xf32>, i32 -> vector<1x256xf32>
    %cst_41 = arith.constant 0.000000e+00 : f32
    %125 = vector.broadcast %cst_41 : f32 to vector<1x256xf32>
    %126 = arith.select %56, %124, %125 : vector<1x256xi1>, vector<1x256xf32>
    %c16_i32_42 = arith.constant 16 : i32
    %127 = tpu.dynamic_rotate %5 by %c16_i32_42 dim 1 : vector<1x256xf32>, i32 -> vector<1x256xf32>
    %cst_43 = arith.constant 0.000000e+00 : f32
    %128 = vector.broadcast %cst_43 : f32 to vector<1x256xf32>
    %129 = arith.select %72, %127, %128 : vector<1x256xi1>, vector<1x256xf32>
    %c240_i32 = arith.constant 240 : i32
    %130 = tpu.dynamic_rotate %5 by %c240_i32 dim 1 : vector<1x256xf32>, i32 -> vector<1x256xf32>
    %cst_44 = arith.constant 0.000000e+00 : f32
    %131 = vector.broadcast %cst_44 : f32 to vector<1x256xf32>
    %132 = arith.select %88, %130, %131 : vector<1x256xi1>, vector<1x256xf32>
    %c224_i32 = arith.constant 224 : i32
    %133 = tpu.dynamic_rotate %5 by %c224_i32 dim 1 : vector<1x256xf32>, i32 -> vector<1x256xf32>
    %cst_45 = arith.constant 0.000000e+00 : f32
    %134 = vector.broadcast %cst_45 : f32 to vector<1x256xf32>
    %135 = arith.select %104, %133, %134 : vector<1x256xi1>, vector<1x256xf32>
    %c208_i32 = arith.constant 208 : i32
    %136 = tpu.dynamic_rotate %5 by %c208_i32 dim 1 : vector<1x256xf32>, i32 -> vector<1x256xf32>
    %cst_46 = arith.constant 0.000000e+00 : f32
    %137 = vector.broadcast %cst_46 : f32 to vector<1x256xf32>
    %138 = arith.select %120, %136, %137 : vector<1x256xi1>, vector<1x256xf32>
    %c48_i32_47 = arith.constant 48 : i32
    %139 = tpu.dynamic_rotate %7 by %c48_i32_47 dim 1 : vector<1x256xf32>, i32 -> vector<1x256xf32>
    %cst_48 = arith.constant 0.000000e+00 : f32
    %140 = vector.broadcast %cst_48 : f32 to vector<1x256xf32>
    %141 = arith.select %40, %139, %140 : vector<1x256xi1>, vector<1x256xf32>
    %c32_i32_49 = arith.constant 32 : i32
    %142 = tpu.dynamic_rotate %7 by %c32_i32_49 dim 1 : vector<1x256xf32>, i32 -> vector<1x256xf32>
    %cst_50 = arith.constant 0.000000e+00 : f32
    %143 = vector.broadcast %cst_50 : f32 to vector<1x256xf32>
    %144 = arith.select %56, %142, %143 : vector<1x256xi1>, vector<1x256xf32>
    %c16_i32_51 = arith.constant 16 : i32
    %145 = tpu.dynamic_rotate %7 by %c16_i32_51 dim 1 : vector<1x256xf32>, i32 -> vector<1x256xf32>
    %cst_52 = arith.constant 0.000000e+00 : f32
    %146 = vector.broadcast %cst_52 : f32 to vector<1x256xf32>
    %147 = arith.select %72, %145, %146 : vector<1x256xi1>, vector<1x256xf32>
    %c240_i32_53 = arith.constant 240 : i32
    %148 = tpu.dynamic_rotate %7 by %c240_i32_53 dim 1 : vector<1x256xf32>, i32 -> vector<1x256xf32>
    %cst_54 = arith.constant 0.000000e+00 : f32
    %149 = vector.broadcast %cst_54 : f32 to vector<1x256xf32>
    %150 = arith.select %88, %148, %149 : vector<1x256xi1>, vector<1x256xf32>
    %c224_i32_55 = arith.constant 224 : i32
    %151 = tpu.dynamic_rotate %7 by %c224_i32_55 dim 1 : vector<1x256xf32>, i32 -> vector<1x256xf32>
    %cst_56 = arith.constant 0.000000e+00 : f32
    %152 = vector.broadcast %cst_56 : f32 to vector<1x256xf32>
    %153 = arith.select %104, %151, %152 : vector<1x256xi1>, vector<1x256xf32>
    %c208_i32_57 = arith.constant 208 : i32
    %154 = tpu.dynamic_rotate %7 by %c208_i32_57 dim 1 : vector<1x256xf32>, i32 -> vector<1x256xf32>
    %cst_58 = arith.constant 0.000000e+00 : f32
    %155 = vector.broadcast %cst_58 : f32 to vector<1x256xf32>
    %156 = arith.select %120, %154, %155 : vector<1x256xi1>, vector<1x256xf32>
    %cst_59 = arith.constant 0.000000e+00 : f32
    %157 = vector.broadcast %cst_59 : f32 to vector<1x256xf32>
    %cst_60 = arith.constant 0.000000e+00 : f32
    %158 = vector.broadcast %cst_60 : f32 to vector<1x256xf32>
    %c0_61 = arith.constant 0 : index
    %159 = memref.load %arg1[%c0_61] : memref<98xf32, #tpu.memory_space<smem>>
    %160 = vector.broadcast %159 : f32 to vector<1x256xf32>
    %161 = arith.mulf %160, %123 : vector<1x256xf32>
    %162 = arith.addf %158, %161 : vector<1x256xf32>
    %c7 = arith.constant 7 : index
    %163 = memref.load %arg1[%c7] : memref<98xf32, #tpu.memory_space<smem>>
    %164 = vector.broadcast %163 : f32 to vector<1x256xf32>
    %165 = arith.mulf %164, %126 : vector<1x256xf32>
    %166 = arith.addf %162, %165 : vector<1x256xf32>
    %c14 = arith.constant 14 : index
    %167 = memref.load %arg1[%c14] : memref<98xf32, #tpu.memory_space<smem>>
    %168 = vector.broadcast %167 : f32 to vector<1x256xf32>
    %169 = arith.mulf %168, %129 : vector<1x256xf32>
    %170 = arith.addf %166, %169 : vector<1x256xf32>
    %c21 = arith.constant 21 : index
    %171 = memref.load %arg1[%c21] : memref<98xf32, #tpu.memory_space<smem>>
    %172 = vector.broadcast %171 : f32 to vector<1x256xf32>
    %173 = arith.mulf %172, %5 : vector<1x256xf32>
    %174 = arith.addf %170, %173 : vector<1x256xf32>
    %c28 = arith.constant 28 : index
    %175 = memref.load %arg1[%c28] : memref<98xf32, #tpu.memory_space<smem>>
    %176 = vector.broadcast %175 : f32 to vector<1x256xf32>
    %177 = arith.mulf %176, %132 : vector<1x256xf32>
    %178 = arith.addf %174, %177 : vector<1x256xf32>
    %c35 = arith.constant 35 : index
    %179 = memref.load %arg1[%c35] : memref<98xf32, #tpu.memory_space<smem>>
    %180 = vector.broadcast %179 : f32 to vector<1x256xf32>
    %181 = arith.mulf %180, %135 : vector<1x256xf32>
    %182 = arith.addf %178, %181 : vector<1x256xf32>
    %c42 = arith.constant 42 : index
    %183 = memref.load %arg1[%c42] : memref<98xf32, #tpu.memory_space<smem>>
    %184 = vector.broadcast %183 : f32 to vector<1x256xf32>
    %185 = arith.mulf %184, %138 : vector<1x256xf32>
    %186 = arith.addf %182, %185 : vector<1x256xf32>
    %c49 = arith.constant 49 : index
    %187 = memref.load %arg1[%c49] : memref<98xf32, #tpu.memory_space<smem>>
    %188 = vector.broadcast %187 : f32 to vector<1x256xf32>
    %189 = arith.mulf %188, %141 : vector<1x256xf32>
    %190 = arith.addf %186, %189 : vector<1x256xf32>
    %c56 = arith.constant 56 : index
    %191 = memref.load %arg1[%c56] : memref<98xf32, #tpu.memory_space<smem>>
    %192 = vector.broadcast %191 : f32 to vector<1x256xf32>
    %193 = arith.mulf %192, %144 : vector<1x256xf32>
    %194 = arith.addf %190, %193 : vector<1x256xf32>
    %c63 = arith.constant 63 : index
    %195 = memref.load %arg1[%c63] : memref<98xf32, #tpu.memory_space<smem>>
    %196 = vector.broadcast %195 : f32 to vector<1x256xf32>
    %197 = arith.mulf %196, %147 : vector<1x256xf32>
    %198 = arith.addf %194, %197 : vector<1x256xf32>
    %c70 = arith.constant 70 : index
    %199 = memref.load %arg1[%c70] : memref<98xf32, #tpu.memory_space<smem>>
    %200 = vector.broadcast %199 : f32 to vector<1x256xf32>
    %201 = arith.mulf %200, %7 : vector<1x256xf32>
    %202 = arith.addf %198, %201 : vector<1x256xf32>
    %c77 = arith.constant 77 : index
    %203 = memref.load %arg1[%c77] : memref<98xf32, #tpu.memory_space<smem>>
    %204 = vector.broadcast %203 : f32 to vector<1x256xf32>
    %205 = arith.mulf %204, %150 : vector<1x256xf32>
    %206 = arith.addf %202, %205 : vector<1x256xf32>
    %c84 = arith.constant 84 : index
    %207 = memref.load %arg1[%c84] : memref<98xf32, #tpu.memory_space<smem>>
    %208 = vector.broadcast %207 : f32 to vector<1x256xf32>
    %209 = arith.mulf %208, %153 : vector<1x256xf32>
    %210 = arith.addf %206, %209 : vector<1x256xf32>
    %c91 = arith.constant 91 : index
    %211 = memref.load %arg1[%c91] : memref<98xf32, #tpu.memory_space<smem>>
    %212 = vector.broadcast %211 : f32 to vector<1x256xf32>
    %213 = arith.mulf %212, %156 : vector<1x256xf32>
    %214 = arith.addf %210, %213 : vector<1x256xf32>
    %c3_i32_62 = arith.constant 3 : i32
    %215 = tpu.dynamic_rotate %214 by %c3_i32_62 dim 1 : vector<1x256xf32>, i32 -> vector<1x256xf32>
    %cst_63 = arith.constant 0.000000e+00 : f32
    %216 = vector.broadcast %cst_63 : f32 to vector<1x256xf32>
    %217 = arith.select %33, %215, %216 : vector<1x256xi1>, vector<1x256xf32>
    %218 = arith.addf %157, %217 : vector<1x256xf32>
    %cst_64 = arith.constant 0.000000e+00 : f32
    %219 = vector.broadcast %cst_64 : f32 to vector<1x256xf32>
    %c1 = arith.constant 1 : index
    %220 = memref.load %arg1[%c1] : memref<98xf32, #tpu.memory_space<smem>>
    %221 = vector.broadcast %220 : f32 to vector<1x256xf32>
    %222 = arith.mulf %221, %123 : vector<1x256xf32>
    %223 = arith.addf %219, %222 : vector<1x256xf32>
    %c8 = arith.constant 8 : index
    %224 = memref.load %arg1[%c8] : memref<98xf32, #tpu.memory_space<smem>>
    %225 = vector.broadcast %224 : f32 to vector<1x256xf32>
    %226 = arith.mulf %225, %126 : vector<1x256xf32>
    %227 = arith.addf %223, %226 : vector<1x256xf32>
    %c15 = arith.constant 15 : index
    %228 = memref.load %arg1[%c15] : memref<98xf32, #tpu.memory_space<smem>>
    %229 = vector.broadcast %228 : f32 to vector<1x256xf32>
    %230 = arith.mulf %229, %129 : vector<1x256xf32>
    %231 = arith.addf %227, %230 : vector<1x256xf32>
    %c22 = arith.constant 22 : index
    %232 = memref.load %arg1[%c22] : memref<98xf32, #tpu.memory_space<smem>>
    %233 = vector.broadcast %232 : f32 to vector<1x256xf32>
    %234 = arith.mulf %233, %5 : vector<1x256xf32>
    %235 = arith.addf %231, %234 : vector<1x256xf32>
    %c29 = arith.constant 29 : index
    %236 = memref.load %arg1[%c29] : memref<98xf32, #tpu.memory_space<smem>>
    %237 = vector.broadcast %236 : f32 to vector<1x256xf32>
    %238 = arith.mulf %237, %132 : vector<1x256xf32>
    %239 = arith.addf %235, %238 : vector<1x256xf32>
    %c36 = arith.constant 36 : index
    %240 = memref.load %arg1[%c36] : memref<98xf32, #tpu.memory_space<smem>>
    %241 = vector.broadcast %240 : f32 to vector<1x256xf32>
    %242 = arith.mulf %241, %135 : vector<1x256xf32>
    %243 = arith.addf %239, %242 : vector<1x256xf32>
    %c43 = arith.constant 43 : index
    %244 = memref.load %arg1[%c43] : memref<98xf32, #tpu.memory_space<smem>>
    %245 = vector.broadcast %244 : f32 to vector<1x256xf32>
    %246 = arith.mulf %245, %138 : vector<1x256xf32>
    %247 = arith.addf %243, %246 : vector<1x256xf32>
    %c50 = arith.constant 50 : index
    %248 = memref.load %arg1[%c50] : memref<98xf32, #tpu.memory_space<smem>>
    %249 = vector.broadcast %248 : f32 to vector<1x256xf32>
    %250 = arith.mulf %249, %141 : vector<1x256xf32>
    %251 = arith.addf %247, %250 : vector<1x256xf32>
    %c57 = arith.constant 57 : index
    %252 = memref.load %arg1[%c57] : memref<98xf32, #tpu.memory_space<smem>>
    %253 = vector.broadcast %252 : f32 to vector<1x256xf32>
    %254 = arith.mulf %253, %144 : vector<1x256xf32>
    %255 = arith.addf %251, %254 : vector<1x256xf32>
    %c64 = arith.constant 64 : index
    %256 = memref.load %arg1[%c64] : memref<98xf32, #tpu.memory_space<smem>>
    %257 = vector.broadcast %256 : f32 to vector<1x256xf32>
    %258 = arith.mulf %257, %147 : vector<1x256xf32>
    %259 = arith.addf %255, %258 : vector<1x256xf32>
    %c71 = arith.constant 71 : index
    %260 = memref.load %arg1[%c71] : memref<98xf32, #tpu.memory_space<smem>>
    %261 = vector.broadcast %260 : f32 to vector<1x256xf32>
    %262 = arith.mulf %261, %7 : vector<1x256xf32>
    %263 = arith.addf %259, %262 : vector<1x256xf32>
    %c78 = arith.constant 78 : index
    %264 = memref.load %arg1[%c78] : memref<98xf32, #tpu.memory_space<smem>>
    %265 = vector.broadcast %264 : f32 to vector<1x256xf32>
    %266 = arith.mulf %265, %150 : vector<1x256xf32>
    %267 = arith.addf %263, %266 : vector<1x256xf32>
    %c85 = arith.constant 85 : index
    %268 = memref.load %arg1[%c85] : memref<98xf32, #tpu.memory_space<smem>>
    %269 = vector.broadcast %268 : f32 to vector<1x256xf32>
    %270 = arith.mulf %269, %153 : vector<1x256xf32>
    %271 = arith.addf %267, %270 : vector<1x256xf32>
    %c92 = arith.constant 92 : index
    %272 = memref.load %arg1[%c92] : memref<98xf32, #tpu.memory_space<smem>>
    %273 = vector.broadcast %272 : f32 to vector<1x256xf32>
    %274 = arith.mulf %273, %156 : vector<1x256xf32>
    %275 = arith.addf %271, %274 : vector<1x256xf32>
    %c2_i32_65 = arith.constant 2 : i32
    %276 = tpu.dynamic_rotate %275 by %c2_i32_65 dim 1 : vector<1x256xf32>, i32 -> vector<1x256xf32>
    %cst_66 = arith.constant 0.000000e+00 : f32
    %277 = vector.broadcast %cst_66 : f32 to vector<1x256xf32>
    %278 = arith.select %49, %276, %277 : vector<1x256xi1>, vector<1x256xf32>
    %279 = arith.addf %218, %278 : vector<1x256xf32>
    %cst_67 = arith.constant 0.000000e+00 : f32
    %280 = vector.broadcast %cst_67 : f32 to vector<1x256xf32>
    %c2 = arith.constant 2 : index
    %281 = memref.load %arg1[%c2] : memref<98xf32, #tpu.memory_space<smem>>
    %282 = vector.broadcast %281 : f32 to vector<1x256xf32>
    %283 = arith.mulf %282, %123 : vector<1x256xf32>
    %284 = arith.addf %280, %283 : vector<1x256xf32>
    %c9 = arith.constant 9 : index
    %285 = memref.load %arg1[%c9] : memref<98xf32, #tpu.memory_space<smem>>
    %286 = vector.broadcast %285 : f32 to vector<1x256xf32>
    %287 = arith.mulf %286, %126 : vector<1x256xf32>
    %288 = arith.addf %284, %287 : vector<1x256xf32>
    %c16 = arith.constant 16 : index
    %289 = memref.load %arg1[%c16] : memref<98xf32, #tpu.memory_space<smem>>
    %290 = vector.broadcast %289 : f32 to vector<1x256xf32>
    %291 = arith.mulf %290, %129 : vector<1x256xf32>
    %292 = arith.addf %288, %291 : vector<1x256xf32>
    %c23 = arith.constant 23 : index
    %293 = memref.load %arg1[%c23] : memref<98xf32, #tpu.memory_space<smem>>
    %294 = vector.broadcast %293 : f32 to vector<1x256xf32>
    %295 = arith.mulf %294, %5 : vector<1x256xf32>
    %296 = arith.addf %292, %295 : vector<1x256xf32>
    %c30 = arith.constant 30 : index
    %297 = memref.load %arg1[%c30] : memref<98xf32, #tpu.memory_space<smem>>
    %298 = vector.broadcast %297 : f32 to vector<1x256xf32>
    %299 = arith.mulf %298, %132 : vector<1x256xf32>
    %300 = arith.addf %296, %299 : vector<1x256xf32>
    %c37 = arith.constant 37 : index
    %301 = memref.load %arg1[%c37] : memref<98xf32, #tpu.memory_space<smem>>
    %302 = vector.broadcast %301 : f32 to vector<1x256xf32>
    %303 = arith.mulf %302, %135 : vector<1x256xf32>
    %304 = arith.addf %300, %303 : vector<1x256xf32>
    %c44 = arith.constant 44 : index
    %305 = memref.load %arg1[%c44] : memref<98xf32, #tpu.memory_space<smem>>
    %306 = vector.broadcast %305 : f32 to vector<1x256xf32>
    %307 = arith.mulf %306, %138 : vector<1x256xf32>
    %308 = arith.addf %304, %307 : vector<1x256xf32>
    %c51 = arith.constant 51 : index
    %309 = memref.load %arg1[%c51] : memref<98xf32, #tpu.memory_space<smem>>
    %310 = vector.broadcast %309 : f32 to vector<1x256xf32>
    %311 = arith.mulf %310, %141 : vector<1x256xf32>
    %312 = arith.addf %308, %311 : vector<1x256xf32>
    %c58 = arith.constant 58 : index
    %313 = memref.load %arg1[%c58] : memref<98xf32, #tpu.memory_space<smem>>
    %314 = vector.broadcast %313 : f32 to vector<1x256xf32>
    %315 = arith.mulf %314, %144 : vector<1x256xf32>
    %316 = arith.addf %312, %315 : vector<1x256xf32>
    %c65 = arith.constant 65 : index
    %317 = memref.load %arg1[%c65] : memref<98xf32, #tpu.memory_space<smem>>
    %318 = vector.broadcast %317 : f32 to vector<1x256xf32>
    %319 = arith.mulf %318, %147 : vector<1x256xf32>
    %320 = arith.addf %316, %319 : vector<1x256xf32>
    %c72 = arith.constant 72 : index
    %321 = memref.load %arg1[%c72] : memref<98xf32, #tpu.memory_space<smem>>
    %322 = vector.broadcast %321 : f32 to vector<1x256xf32>
    %323 = arith.mulf %322, %7 : vector<1x256xf32>
    %324 = arith.addf %320, %323 : vector<1x256xf32>
    %c79 = arith.constant 79 : index
    %325 = memref.load %arg1[%c79] : memref<98xf32, #tpu.memory_space<smem>>
    %326 = vector.broadcast %325 : f32 to vector<1x256xf32>
    %327 = arith.mulf %326, %150 : vector<1x256xf32>
    %328 = arith.addf %324, %327 : vector<1x256xf32>
    %c86 = arith.constant 86 : index
    %329 = memref.load %arg1[%c86] : memref<98xf32, #tpu.memory_space<smem>>
    %330 = vector.broadcast %329 : f32 to vector<1x256xf32>
    %331 = arith.mulf %330, %153 : vector<1x256xf32>
    %332 = arith.addf %328, %331 : vector<1x256xf32>
    %c93 = arith.constant 93 : index
    %333 = memref.load %arg1[%c93] : memref<98xf32, #tpu.memory_space<smem>>
    %334 = vector.broadcast %333 : f32 to vector<1x256xf32>
    %335 = arith.mulf %334, %156 : vector<1x256xf32>
    %336 = arith.addf %332, %335 : vector<1x256xf32>
    %c1_i32_68 = arith.constant 1 : i32
    %337 = tpu.dynamic_rotate %336 by %c1_i32_68 dim 1 : vector<1x256xf32>, i32 -> vector<1x256xf32>
    %cst_69 = arith.constant 0.000000e+00 : f32
    %338 = vector.broadcast %cst_69 : f32 to vector<1x256xf32>
    %339 = arith.select %65, %337, %338 : vector<1x256xi1>, vector<1x256xf32>
    %340 = arith.addf %279, %339 : vector<1x256xf32>
    %cst_70 = arith.constant 0.000000e+00 : f32
    %341 = vector.broadcast %cst_70 : f32 to vector<1x256xf32>
    %c3 = arith.constant 3 : index
    %342 = memref.load %arg1[%c3] : memref<98xf32, #tpu.memory_space<smem>>
    %343 = vector.broadcast %342 : f32 to vector<1x256xf32>
    %344 = arith.mulf %343, %123 : vector<1x256xf32>
    %345 = arith.addf %341, %344 : vector<1x256xf32>
    %c10 = arith.constant 10 : index
    %346 = memref.load %arg1[%c10] : memref<98xf32, #tpu.memory_space<smem>>
    %347 = vector.broadcast %346 : f32 to vector<1x256xf32>
    %348 = arith.mulf %347, %126 : vector<1x256xf32>
    %349 = arith.addf %345, %348 : vector<1x256xf32>
    %c17 = arith.constant 17 : index
    %350 = memref.load %arg1[%c17] : memref<98xf32, #tpu.memory_space<smem>>
    %351 = vector.broadcast %350 : f32 to vector<1x256xf32>
    %352 = arith.mulf %351, %129 : vector<1x256xf32>
    %353 = arith.addf %349, %352 : vector<1x256xf32>
    %c24 = arith.constant 24 : index
    %354 = memref.load %arg1[%c24] : memref<98xf32, #tpu.memory_space<smem>>
    %355 = vector.broadcast %354 : f32 to vector<1x256xf32>
    %356 = arith.mulf %355, %5 : vector<1x256xf32>
    %357 = arith.addf %353, %356 : vector<1x256xf32>
    %c31 = arith.constant 31 : index
    %358 = memref.load %arg1[%c31] : memref<98xf32, #tpu.memory_space<smem>>
    %359 = vector.broadcast %358 : f32 to vector<1x256xf32>
    %360 = arith.mulf %359, %132 : vector<1x256xf32>
    %361 = arith.addf %357, %360 : vector<1x256xf32>
    %c38 = arith.constant 38 : index
    %362 = memref.load %arg1[%c38] : memref<98xf32, #tpu.memory_space<smem>>
    %363 = vector.broadcast %362 : f32 to vector<1x256xf32>
    %364 = arith.mulf %363, %135 : vector<1x256xf32>
    %365 = arith.addf %361, %364 : vector<1x256xf32>
    %c45 = arith.constant 45 : index
    %366 = memref.load %arg1[%c45] : memref<98xf32, #tpu.memory_space<smem>>
    %367 = vector.broadcast %366 : f32 to vector<1x256xf32>
    %368 = arith.mulf %367, %138 : vector<1x256xf32>
    %369 = arith.addf %365, %368 : vector<1x256xf32>
    %c52 = arith.constant 52 : index
    %370 = memref.load %arg1[%c52] : memref<98xf32, #tpu.memory_space<smem>>
    %371 = vector.broadcast %370 : f32 to vector<1x256xf32>
    %372 = arith.mulf %371, %141 : vector<1x256xf32>
    %373 = arith.addf %369, %372 : vector<1x256xf32>
    %c59 = arith.constant 59 : index
    %374 = memref.load %arg1[%c59] : memref<98xf32, #tpu.memory_space<smem>>
    %375 = vector.broadcast %374 : f32 to vector<1x256xf32>
    %376 = arith.mulf %375, %144 : vector<1x256xf32>
    %377 = arith.addf %373, %376 : vector<1x256xf32>
    %c66 = arith.constant 66 : index
    %378 = memref.load %arg1[%c66] : memref<98xf32, #tpu.memory_space<smem>>
    %379 = vector.broadcast %378 : f32 to vector<1x256xf32>
    %380 = arith.mulf %379, %147 : vector<1x256xf32>
    %381 = arith.addf %377, %380 : vector<1x256xf32>
    %c73 = arith.constant 73 : index
    %382 = memref.load %arg1[%c73] : memref<98xf32, #tpu.memory_space<smem>>
    %383 = vector.broadcast %382 : f32 to vector<1x256xf32>
    %384 = arith.mulf %383, %7 : vector<1x256xf32>
    %385 = arith.addf %381, %384 : vector<1x256xf32>
    %c80 = arith.constant 80 : index
    %386 = memref.load %arg1[%c80] : memref<98xf32, #tpu.memory_space<smem>>
    %387 = vector.broadcast %386 : f32 to vector<1x256xf32>
    %388 = arith.mulf %387, %150 : vector<1x256xf32>
    %389 = arith.addf %385, %388 : vector<1x256xf32>
    %c87 = arith.constant 87 : index
    %390 = memref.load %arg1[%c87] : memref<98xf32, #tpu.memory_space<smem>>
    %391 = vector.broadcast %390 : f32 to vector<1x256xf32>
    %392 = arith.mulf %391, %153 : vector<1x256xf32>
    %393 = arith.addf %389, %392 : vector<1x256xf32>
    %c94 = arith.constant 94 : index
    %394 = memref.load %arg1[%c94] : memref<98xf32, #tpu.memory_space<smem>>
    %395 = vector.broadcast %394 : f32 to vector<1x256xf32>
    %396 = arith.mulf %395, %156 : vector<1x256xf32>
    %397 = arith.addf %393, %396 : vector<1x256xf32>
    %398 = arith.addf %340, %397 : vector<1x256xf32>
    %cst_71 = arith.constant 0.000000e+00 : f32
    %399 = vector.broadcast %cst_71 : f32 to vector<1x256xf32>
    %c4 = arith.constant 4 : index
    %400 = memref.load %arg1[%c4] : memref<98xf32, #tpu.memory_space<smem>>
    %401 = vector.broadcast %400 : f32 to vector<1x256xf32>
    %402 = arith.mulf %401, %123 : vector<1x256xf32>
    %403 = arith.addf %399, %402 : vector<1x256xf32>
    %c11 = arith.constant 11 : index
    %404 = memref.load %arg1[%c11] : memref<98xf32, #tpu.memory_space<smem>>
    %405 = vector.broadcast %404 : f32 to vector<1x256xf32>
    %406 = arith.mulf %405, %126 : vector<1x256xf32>
    %407 = arith.addf %403, %406 : vector<1x256xf32>
    %c18 = arith.constant 18 : index
    %408 = memref.load %arg1[%c18] : memref<98xf32, #tpu.memory_space<smem>>
    %409 = vector.broadcast %408 : f32 to vector<1x256xf32>
    %410 = arith.mulf %409, %129 : vector<1x256xf32>
    %411 = arith.addf %407, %410 : vector<1x256xf32>
    %c25 = arith.constant 25 : index
    %412 = memref.load %arg1[%c25] : memref<98xf32, #tpu.memory_space<smem>>
    %413 = vector.broadcast %412 : f32 to vector<1x256xf32>
    %414 = arith.mulf %413, %5 : vector<1x256xf32>
    %415 = arith.addf %411, %414 : vector<1x256xf32>
    %c32 = arith.constant 32 : index
    %416 = memref.load %arg1[%c32] : memref<98xf32, #tpu.memory_space<smem>>
    %417 = vector.broadcast %416 : f32 to vector<1x256xf32>
    %418 = arith.mulf %417, %132 : vector<1x256xf32>
    %419 = arith.addf %415, %418 : vector<1x256xf32>
    %c39 = arith.constant 39 : index
    %420 = memref.load %arg1[%c39] : memref<98xf32, #tpu.memory_space<smem>>
    %421 = vector.broadcast %420 : f32 to vector<1x256xf32>
    %422 = arith.mulf %421, %135 : vector<1x256xf32>
    %423 = arith.addf %419, %422 : vector<1x256xf32>
    %c46 = arith.constant 46 : index
    %424 = memref.load %arg1[%c46] : memref<98xf32, #tpu.memory_space<smem>>
    %425 = vector.broadcast %424 : f32 to vector<1x256xf32>
    %426 = arith.mulf %425, %138 : vector<1x256xf32>
    %427 = arith.addf %423, %426 : vector<1x256xf32>
    %c53 = arith.constant 53 : index
    %428 = memref.load %arg1[%c53] : memref<98xf32, #tpu.memory_space<smem>>
    %429 = vector.broadcast %428 : f32 to vector<1x256xf32>
    %430 = arith.mulf %429, %141 : vector<1x256xf32>
    %431 = arith.addf %427, %430 : vector<1x256xf32>
    %c60 = arith.constant 60 : index
    %432 = memref.load %arg1[%c60] : memref<98xf32, #tpu.memory_space<smem>>
    %433 = vector.broadcast %432 : f32 to vector<1x256xf32>
    %434 = arith.mulf %433, %144 : vector<1x256xf32>
    %435 = arith.addf %431, %434 : vector<1x256xf32>
    %c67 = arith.constant 67 : index
    %436 = memref.load %arg1[%c67] : memref<98xf32, #tpu.memory_space<smem>>
    %437 = vector.broadcast %436 : f32 to vector<1x256xf32>
    %438 = arith.mulf %437, %147 : vector<1x256xf32>
    %439 = arith.addf %435, %438 : vector<1x256xf32>
    %c74 = arith.constant 74 : index
    %440 = memref.load %arg1[%c74] : memref<98xf32, #tpu.memory_space<smem>>
    %441 = vector.broadcast %440 : f32 to vector<1x256xf32>
    %442 = arith.mulf %441, %7 : vector<1x256xf32>
    %443 = arith.addf %439, %442 : vector<1x256xf32>
    %c81 = arith.constant 81 : index
    %444 = memref.load %arg1[%c81] : memref<98xf32, #tpu.memory_space<smem>>
    %445 = vector.broadcast %444 : f32 to vector<1x256xf32>
    %446 = arith.mulf %445, %150 : vector<1x256xf32>
    %447 = arith.addf %443, %446 : vector<1x256xf32>
    %c88 = arith.constant 88 : index
    %448 = memref.load %arg1[%c88] : memref<98xf32, #tpu.memory_space<smem>>
    %449 = vector.broadcast %448 : f32 to vector<1x256xf32>
    %450 = arith.mulf %449, %153 : vector<1x256xf32>
    %451 = arith.addf %447, %450 : vector<1x256xf32>
    %c95 = arith.constant 95 : index
    %452 = memref.load %arg1[%c95] : memref<98xf32, #tpu.memory_space<smem>>
    %453 = vector.broadcast %452 : f32 to vector<1x256xf32>
    %454 = arith.mulf %453, %156 : vector<1x256xf32>
    %455 = arith.addf %451, %454 : vector<1x256xf32>
    %c255_i32 = arith.constant 255 : i32
    %456 = tpu.dynamic_rotate %455 by %c255_i32 dim 1 : vector<1x256xf32>, i32 -> vector<1x256xf32>
    %cst_72 = arith.constant 0.000000e+00 : f32
    %457 = vector.broadcast %cst_72 : f32 to vector<1x256xf32>
    %458 = arith.select %81, %456, %457 : vector<1x256xi1>, vector<1x256xf32>
    %459 = arith.addf %398, %458 : vector<1x256xf32>
    %cst_73 = arith.constant 0.000000e+00 : f32
    %460 = vector.broadcast %cst_73 : f32 to vector<1x256xf32>
    %c5 = arith.constant 5 : index
    %461 = memref.load %arg1[%c5] : memref<98xf32, #tpu.memory_space<smem>>
    %462 = vector.broadcast %461 : f32 to vector<1x256xf32>
    %463 = arith.mulf %462, %123 : vector<1x256xf32>
    %464 = arith.addf %460, %463 : vector<1x256xf32>
    %c12 = arith.constant 12 : index
    %465 = memref.load %arg1[%c12] : memref<98xf32, #tpu.memory_space<smem>>
    %466 = vector.broadcast %465 : f32 to vector<1x256xf32>
    %467 = arith.mulf %466, %126 : vector<1x256xf32>
    %468 = arith.addf %464, %467 : vector<1x256xf32>
    %c19 = arith.constant 19 : index
    %469 = memref.load %arg1[%c19] : memref<98xf32, #tpu.memory_space<smem>>
    %470 = vector.broadcast %469 : f32 to vector<1x256xf32>
    %471 = arith.mulf %470, %129 : vector<1x256xf32>
    %472 = arith.addf %468, %471 : vector<1x256xf32>
    %c26 = arith.constant 26 : index
    %473 = memref.load %arg1[%c26] : memref<98xf32, #tpu.memory_space<smem>>
    %474 = vector.broadcast %473 : f32 to vector<1x256xf32>
    %475 = arith.mulf %474, %5 : vector<1x256xf32>
    %476 = arith.addf %472, %475 : vector<1x256xf32>
    %c33 = arith.constant 33 : index
    %477 = memref.load %arg1[%c33] : memref<98xf32, #tpu.memory_space<smem>>
    %478 = vector.broadcast %477 : f32 to vector<1x256xf32>
    %479 = arith.mulf %478, %132 : vector<1x256xf32>
    %480 = arith.addf %476, %479 : vector<1x256xf32>
    %c40 = arith.constant 40 : index
    %481 = memref.load %arg1[%c40] : memref<98xf32, #tpu.memory_space<smem>>
    %482 = vector.broadcast %481 : f32 to vector<1x256xf32>
    %483 = arith.mulf %482, %135 : vector<1x256xf32>
    %484 = arith.addf %480, %483 : vector<1x256xf32>
    %c47 = arith.constant 47 : index
    %485 = memref.load %arg1[%c47] : memref<98xf32, #tpu.memory_space<smem>>
    %486 = vector.broadcast %485 : f32 to vector<1x256xf32>
    %487 = arith.mulf %486, %138 : vector<1x256xf32>
    %488 = arith.addf %484, %487 : vector<1x256xf32>
    %c54 = arith.constant 54 : index
    %489 = memref.load %arg1[%c54] : memref<98xf32, #tpu.memory_space<smem>>
    %490 = vector.broadcast %489 : f32 to vector<1x256xf32>
    %491 = arith.mulf %490, %141 : vector<1x256xf32>
    %492 = arith.addf %488, %491 : vector<1x256xf32>
    %c61 = arith.constant 61 : index
    %493 = memref.load %arg1[%c61] : memref<98xf32, #tpu.memory_space<smem>>
    %494 = vector.broadcast %493 : f32 to vector<1x256xf32>
    %495 = arith.mulf %494, %144 : vector<1x256xf32>
    %496 = arith.addf %492, %495 : vector<1x256xf32>
    %c68 = arith.constant 68 : index
    %497 = memref.load %arg1[%c68] : memref<98xf32, #tpu.memory_space<smem>>
    %498 = vector.broadcast %497 : f32 to vector<1x256xf32>
    %499 = arith.mulf %498, %147 : vector<1x256xf32>
    %500 = arith.addf %496, %499 : vector<1x256xf32>
    %c75 = arith.constant 75 : index
    %501 = memref.load %arg1[%c75] : memref<98xf32, #tpu.memory_space<smem>>
    %502 = vector.broadcast %501 : f32 to vector<1x256xf32>
    %503 = arith.mulf %502, %7 : vector<1x256xf32>
    %504 = arith.addf %500, %503 : vector<1x256xf32>
    %c82 = arith.constant 82 : index
    %505 = memref.load %arg1[%c82] : memref<98xf32, #tpu.memory_space<smem>>
    %506 = vector.broadcast %505 : f32 to vector<1x256xf32>
    %507 = arith.mulf %506, %150 : vector<1x256xf32>
    %508 = arith.addf %504, %507 : vector<1x256xf32>
    %c89 = arith.constant 89 : index
    %509 = memref.load %arg1[%c89] : memref<98xf32, #tpu.memory_space<smem>>
    %510 = vector.broadcast %509 : f32 to vector<1x256xf32>
    %511 = arith.mulf %510, %153 : vector<1x256xf32>
    %512 = arith.addf %508, %511 : vector<1x256xf32>
    %c96 = arith.constant 96 : index
    %513 = memref.load %arg1[%c96] : memref<98xf32, #tpu.memory_space<smem>>
    %514 = vector.broadcast %513 : f32 to vector<1x256xf32>
    %515 = arith.mulf %514, %156 : vector<1x256xf32>
    %516 = arith.addf %512, %515 : vector<1x256xf32>
    %c254_i32 = arith.constant 254 : i32
    %517 = tpu.dynamic_rotate %516 by %c254_i32 dim 1 : vector<1x256xf32>, i32 -> vector<1x256xf32>
    %cst_74 = arith.constant 0.000000e+00 : f32
    %518 = vector.broadcast %cst_74 : f32 to vector<1x256xf32>
    %519 = arith.select %97, %517, %518 : vector<1x256xi1>, vector<1x256xf32>
    %520 = arith.addf %459, %519 : vector<1x256xf32>
    %cst_75 = arith.constant 0.000000e+00 : f32
    %521 = vector.broadcast %cst_75 : f32 to vector<1x256xf32>
    %c6 = arith.constant 6 : index
    %522 = memref.load %arg1[%c6] : memref<98xf32, #tpu.memory_space<smem>>
    %523 = vector.broadcast %522 : f32 to vector<1x256xf32>
    %524 = arith.mulf %523, %123 : vector<1x256xf32>
    %525 = arith.addf %521, %524 : vector<1x256xf32>
    %c13 = arith.constant 13 : index
    %526 = memref.load %arg1[%c13] : memref<98xf32, #tpu.memory_space<smem>>
    %527 = vector.broadcast %526 : f32 to vector<1x256xf32>
    %528 = arith.mulf %527, %126 : vector<1x256xf32>
    %529 = arith.addf %525, %528 : vector<1x256xf32>
    %c20 = arith.constant 20 : index
    %530 = memref.load %arg1[%c20] : memref<98xf32, #tpu.memory_space<smem>>
    %531 = vector.broadcast %530 : f32 to vector<1x256xf32>
    %532 = arith.mulf %531, %129 : vector<1x256xf32>
    %533 = arith.addf %529, %532 : vector<1x256xf32>
    %c27 = arith.constant 27 : index
    %534 = memref.load %arg1[%c27] : memref<98xf32, #tpu.memory_space<smem>>
    %535 = vector.broadcast %534 : f32 to vector<1x256xf32>
    %536 = arith.mulf %535, %5 : vector<1x256xf32>
    %537 = arith.addf %533, %536 : vector<1x256xf32>
    %c34 = arith.constant 34 : index
    %538 = memref.load %arg1[%c34] : memref<98xf32, #tpu.memory_space<smem>>
    %539 = vector.broadcast %538 : f32 to vector<1x256xf32>
    %540 = arith.mulf %539, %132 : vector<1x256xf32>
    %541 = arith.addf %537, %540 : vector<1x256xf32>
    %c41 = arith.constant 41 : index
    %542 = memref.load %arg1[%c41] : memref<98xf32, #tpu.memory_space<smem>>
    %543 = vector.broadcast %542 : f32 to vector<1x256xf32>
    %544 = arith.mulf %543, %135 : vector<1x256xf32>
    %545 = arith.addf %541, %544 : vector<1x256xf32>
    %c48 = arith.constant 48 : index
    %546 = memref.load %arg1[%c48] : memref<98xf32, #tpu.memory_space<smem>>
    %547 = vector.broadcast %546 : f32 to vector<1x256xf32>
    %548 = arith.mulf %547, %138 : vector<1x256xf32>
    %549 = arith.addf %545, %548 : vector<1x256xf32>
    %c55 = arith.constant 55 : index
    %550 = memref.load %arg1[%c55] : memref<98xf32, #tpu.memory_space<smem>>
    %551 = vector.broadcast %550 : f32 to vector<1x256xf32>
    %552 = arith.mulf %551, %141 : vector<1x256xf32>
    %553 = arith.addf %549, %552 : vector<1x256xf32>
    %c62 = arith.constant 62 : index
    %554 = memref.load %arg1[%c62] : memref<98xf32, #tpu.memory_space<smem>>
    %555 = vector.broadcast %554 : f32 to vector<1x256xf32>
    %556 = arith.mulf %555, %144 : vector<1x256xf32>
    %557 = arith.addf %553, %556 : vector<1x256xf32>
    %c69 = arith.constant 69 : index
    %558 = memref.load %arg1[%c69] : memref<98xf32, #tpu.memory_space<smem>>
    %559 = vector.broadcast %558 : f32 to vector<1x256xf32>
    %560 = arith.mulf %559, %147 : vector<1x256xf32>
    %561 = arith.addf %557, %560 : vector<1x256xf32>
    %c76 = arith.constant 76 : index
    %562 = memref.load %arg1[%c76] : memref<98xf32, #tpu.memory_space<smem>>
    %563 = vector.broadcast %562 : f32 to vector<1x256xf32>
    %564 = arith.mulf %563, %7 : vector<1x256xf32>
    %565 = arith.addf %561, %564 : vector<1x256xf32>
    %c83 = arith.constant 83 : index
    %566 = memref.load %arg1[%c83] : memref<98xf32, #tpu.memory_space<smem>>
    %567 = vector.broadcast %566 : f32 to vector<1x256xf32>
    %568 = arith.mulf %567, %150 : vector<1x256xf32>
    %569 = arith.addf %565, %568 : vector<1x256xf32>
    %c90 = arith.constant 90 : index
    %570 = memref.load %arg1[%c90] : memref<98xf32, #tpu.memory_space<smem>>
    %571 = vector.broadcast %570 : f32 to vector<1x256xf32>
    %572 = arith.mulf %571, %153 : vector<1x256xf32>
    %573 = arith.addf %569, %572 : vector<1x256xf32>
    %c97 = arith.constant 97 : index
    %574 = memref.load %arg1[%c97] : memref<98xf32, #tpu.memory_space<smem>>
    %575 = vector.broadcast %574 : f32 to vector<1x256xf32>
    %576 = arith.mulf %575, %156 : vector<1x256xf32>
    %577 = arith.addf %573, %576 : vector<1x256xf32>
    %c253_i32 = arith.constant 253 : i32
    %578 = tpu.dynamic_rotate %577 by %c253_i32 dim 1 : vector<1x256xf32>, i32 -> vector<1x256xf32>
    %cst_76 = arith.constant 0.000000e+00 : f32
    %579 = vector.broadcast %cst_76 : f32 to vector<1x256xf32>
    %580 = arith.select %113, %578, %579 : vector<1x256xi1>, vector<1x256xf32>
    %581 = arith.addf %520, %580 : vector<1x256xf32>
    %cst_77 = arith.constant 0.000000e+00 : f32
    %582 = vector.broadcast %cst_77 : f32 to vector<1x256xf32>
    %583 = arith.cmpf ogt, %581, %582 : vector<1x256xf32>
    %cst_78 = arith.constant 0.00999999977 : f32
    %584 = vector.broadcast %cst_78 : f32 to vector<1x256xf32>
    %585 = arith.mulf %584, %581 : vector<1x256xf32>
    %586 = arith.select %583, %581, %585 : vector<1x256xi1>, vector<1x256xf32>
    %c0_79 = arith.constant 0 : index
    %c0_80 = arith.constant 0 : index
    %c0_81 = arith.constant 0 : index
    %587 = vector.load %arg2[%c0_79, %c0_80, %c0_81] : memref<1x4x256xf32, #tpu.memory_space<vmem>>, vector<1x4x256xf32>
    %588 = vector.shape_cast %587 : vector<1x4x256xf32> to vector<4x256xf32>
    %589 = vector.broadcast %586 : vector<1x256xf32> to vector<4x256xf32>
    %590 = arith.mulf %588, %589 : vector<4x256xf32>
    %c0_82 = arith.constant 0 : index
    %c0_83 = arith.constant 0 : index
    %c0_84 = arith.constant 0 : index
    %591 = vector.load %arg3[%c0_82, %c0_83, %c0_84] : memref<1x4x256xf32, #tpu.memory_space<vmem>>, vector<1x4x256xf32>
    %592 = vector.shape_cast %591 : vector<1x4x256xf32> to vector<4x256xf32>
    %593 = vector.shape_cast %590 : vector<4x256xf32> to vector<1x4x256xf32>
    tpu.vector_store %arg3[%c0_82, %c0_83, %c0_84], %593 {strides = array<i32>} : memref<1x4x256xf32, #tpu.memory_space<vmem>>, vector<1x4x256xf32>,
    return
  }
  func.func @transform_0(%arg0: i32, %arg1: memref<98xf32, #tpu.memory_space<smem>>) -> (i32, i32, i32) {
    %c0_i32 = arith.constant 0 : i32
    %c0_i32_0 = arith.constant 0 : i32
    %c0_i32_1 = arith.constant 0 : i32
    return %arg0, %c0_i32, %c0_i32_0 : i32, i32, i32
  }
  func.func @transform_1(%arg0: i32, %arg1: memref<98xf32, #tpu.memory_space<smem>>) -> (i32, i32, i32) {
    %c0_i32 = arith.constant 0 : i32
    %c0_i32_0 = arith.constant 0 : i32
    %c0_i32_1 = arith.constant 0 : i32
    return %arg0, %c0_i32, %c0_i32_0 : i32, i32, i32
  }
}

</mosaic_0001>

<bundles_post_ra>
// kernel: tpu_custom_call.1
= control target key start
LH: loop header
LB: loop body
LE: loop exit
PB: predicated region body
PF: predicated region fallthrough
CT: control target
= control target key end

     0   :  { %s2927_s0 = inlined_call_operand.hbm [shape: f32[98], index: 0, kind: input, shape index: {}]   ;;  %s2928_s1 = inlined_call_operand.hbm [shape: f32[2,4,256], index: 1, kind: input, shape index: {}]   ;;  %s2929_s2 = inlined_call_operand.hbm [shape: f32[2,4,256], index: 2, kind: output, shape index: {}]  }
   0x1   :  { %3066 = sst [smem:[#allocation131_spill]] %s2928_s1  ;;  %s1333_s11 = scalar_lea.hbm %s2927_s0, 16 }
   0x2   :  { %3067 = sst [smem:[#allocation132_spill]] %s2929_s2  ;;  %p1334_p0 = scmp.ne.s32.totalorder %s2927_s0, %s1333_s11 }
   0x3   :  { %p1337_p1 = scmp.lt.u32.totalorder %s1333_s11, %s2927_s0 }
   0x5   :  { %p1339_p2 = pnand %p1337_p1, %p1334_p0 }
   0x7   :  { %1342 = shalt.err (!%p1339_p2)  }
   0x8   :  { %s1443_s16 = smov [#allocation3]  }
   0x9   :  { %8 = dma.hbm_to_smem %s2927_s0, 16, %s1443_s16, [#allocation2] }
   0xa   :  { %1417 = dma.done.wait [#allocation2], 16 }
   0xb   :  { %1418 = vsyncadd [#allocation2], 4294967280 }
   0xc   :  { %10 = sfence }
   0xd   :  { %11 = vsyncpa [#allocation5], 0 }
   0xe   :  { %13 = vsyncpa [#allocation5 + $0x1], 0 }
   0xf   :  { %14 = vsyncpa [#allocation6], 0 }
  0x10   :  { %16 = vsyncpa [#allocation6 + $0x1], 0  ;;  %s1485_s19 = smov 0   ;;  %s1487_s20 = smov 0  }
  0x11   :  { %s1489_s21 = smov 0   ;;  %s1491_s22 = smov 0  }
  0x12 LB: > { %3068 = sst [smem:[#allocation11_spill]] %s1429_s19  ;;  %s1506_s0 = sadd.s32 4294967295, %s1441_s22   ;;  %s1441_s22 = sphi %s1491_s22, %s3496_s22   ;;  %s1437_s21 = sphi %s1489_s21, %s3499_s21   ;;  %s1433_s20 = sphi %s1487_s20, %s3498_s20   ;;  %s1429_s19 = sphi %s1485_s19, %s3497_s19  }
  0x13   : > { %3069 = sst [smem:[#allocation12_spill]] %s1433_s20  ;;  %s1159_s23 = sadd.s32 4294967294, %s1441_s22  }
  0x14   : > { %3070 = sst [smem:[#allocation13_spill]] %s1437_s21  ;;  %s1510_s24 = sadd.s32 1, %s1441_s22  }
  0x15   : > { %3071 = sst [smem:[#allocation14_spill]] %s1441_s22  ;;  %s29_s25 = sadd.s32 1, %s1437_s21 }
  0x16   : > { %3072 = sst [smem:[#allocation15_spill]] %s1506_s0  ;;  %s26_s26 = ssub.s32 %s1441_s22, %s1510_s24 }
  0x17   : > { %3073 = sst [smem:[#allocation16_spill]] %s1510_s24  ;;  %p36_p3 = scmp.ne.s32.totalorder %s1437_s21, %s1433_s20 }
  0x18   : > { %p27_p4 = scmp.eq.s32.totalorder %s26_s26, 0  ;;  %p37_p5 = scmp.eq.s32.totalorder %s1441_s22, 0 }
  0x19   : > { %p42_p6 = scmp.ne.s32.totalorder %s1433_s20, %s1429_s19  ;;  %p43_p7 = scmp.eq.s32.totalorder %s1506_s0, 0 }
  0x1a   : > { %s1522_s27 = scalar_select %p27_p4, %s1437_s21, %s29_s25  }
  0x1b   : > { %p1524_p8 = por %p37_p5, %p36_p3  ;;  %p1528_p9 = por %p43_p7, %p42_p6 }
  0x1c   : > { %3074 = sst [smem:[#allocation17_spill]] %s1522_s27  ;;  %p66_p10 = scmp.eq.s32.totalorder %s1506_s0, 1 }
  0x1d   : > { %p72_p11 = scmp.eq.s32.totalorder %s1159_s23, 1  ;;  %p1284_p13 = scmp.lt.s32.totalorder %s1441_s22, 2 }
  0x1e   : > { %p1535_p0 = por %p66_p10, %p36_p3  ;;  %s92_s4 = sand.u32 1, %s1437_s21  }
  0x1f   : > { %p1539_p1 = por %p72_p11, %p42_p6  ;;  %s1270_s5 = sshll.u32 %s1441_s22, 7 }
  0x20   : > { %s3077_s30 = scalar_select %p1535_p0, 1, 0 }
  0x21   : > { %s3079_s3 = scalar_select %p1539_p1, 1, 0 }
  0x22   : > { %3078 = sst [smem:[#allocation18_spill]] %s3077_s30  ;;  %s1162_s6 = sshll.u32 %s92_s4, 3 }
  0x23   : > { %3080 = sst [smem:[#allocation19_spill]] %s3079_s3  ;;  %s3081_s1 = sld [smem:[#allocation131_spill]] }
  0x24   : > { %s96_s10 = scalar_lea.vmem [#allocation4], %s1162_s6  ;;  %p1552_p2 = pnand %p1284_p13, %p1524_p8 }
  0x25   : > { %s104_s11 = sshll.u32 %s96_s10, 4  ;;  %s93_s13 = scalar_lea.sflag [#allocation5], %s92_s4  ;;  %s1556_s11 = int_to_ptr.vmem [resolvable:$true] %s104_s11 }
  0x26   : > { %p1345_p6 = pneg %p1552_p2 }
  0x29   : > { %s1548_s9 = scalar_lea.hbm %s3081_s1, %s1270_s5  ;;  %s1348_s17 = scalar_lea.hbm %s3081_s1, 256 }
  0x2a   : > { %s1343_s14 = scalar_lea.hbm %s1548_s9, 128  ;;  %p1349_p8 = scmp.lt.u32.totalorder %s1548_s9, %s3081_s1 }
  0x2b   : > { %p1344_p5 = scmp.ne.s32.totalorder %s1548_s9, %s1343_s14  ;;  %p1350_p11 = scmp.lt.u32.totalorder %s1348_s17, %s1343_s14 }
  0x2c   : > { %p1352_p12 = scmp.lt.u32.totalorder %s1343_s14, %s1548_s9 }
  0x2d   : > { %p1346_p7 = pnand %p1345_p6, %p1344_p5  ;;  %p1351_p13 = por %p1350_p11, %p1349_p8 }
  0x2f   : > { %p1347_p10 = pneg %p1346_p7  ;;  %p1353_p3 = por %p1352_p12, %p1351_p13 }
  0x31   : > { %p1354_p4 = pnand %p1353_p3, %p1347_p10 }
  0x33   : > { %1357 = shalt.err (!%p1354_p4)
}
  0x34   : > { %s1358_s25 = scalar_lea.vmem %s1556_s11, 128  ;;  %s1444_s26 = smov [#allocation4]  }
  0x35   : > { %p1359_p5 = scmp.ne.s32.totalorder %s1556_s11, %s1358_s25  ;;  %s1363_s28 = sshll.u32 %s1444_s26, 4  ;;  %s1364_s28 = int_to_ptr.vmem [resolvable:$false] %s1363_s28 }
  0x36   : > { %s1365_s4 = scalar_lea.vmem %s1364_s28, 256  ;;  %p1366_p0 = scmp.lt.s32.totalorder %s1556_s11, %s1364_s28 }
  0x37   : > { %p1361_p7 = pnand %p1359_p5, %p1345_p6  ;;  %p1367_p8 = scmp.lt.s32.totalorder %s1365_s4, %s1358_s25 }
  0x39   : > { %p1362_p1 = pneg %p1361_p7  ;;  %p1368_p11 = por %p1367_p8, %p1366_p0 }
  0x3b   : > { %p1369_p12 = pnand %p1368_p11, %p1362_p1 }
  0x3d   : > { %1372 = shalt.err (!%p1369_p12)
}
  0x3e   : > { %1279 = dma.hbm_to_vmem [thread:$0]  (!%p1552_p2), %s1548_s9, 128, %s1556_s11, %s93_s13  }
  0x3f   : > { %p3083_p3 = scmp.lt.s32.totalorder %s1441_s22, 3  ;;  %p3084_p4 = scmp.ge.s32.totalorder %s1441_s22, 1 }
  0x41   : > { %p110_p6 = pnand %p3084_p4, %p3083_p3 }
  0x43   : > { %113 = sbr.rel (%p110_p6) target bundleno = 492 (0x1ec), region = 24 }
  0x4a   : > { %s1590_s5 = sand.u32 1, %s1433_s20  }
  0x4b   : > { %3085 = sst [smem:[#allocation20_spill]] %s1590_s5  ;;  %s2931_s6 = sshll.u32 %s1590_s5, 3 }
  0x4c   : > { %s116_s7 = scalar_lea.sflag [#allocation5], %s1590_s5  ;;  %s1596_s8 = scalar_lea.vmem [#allocation4], %s2931_s6 }
  0x4d   : > { %3086 = sst [smem:[#allocation21_spill]] %s1596_s8 }
  0x4e   : > { %1420 = dma.done.wait (%p1528_p9), %s116_s7, 128  }
  0x4f   : > { %1422 = vsyncadd (%p1528_p9), %s116_s7, 4294967168  ;;  %vm142_vm0 = vcmask 1043456   ;;  %v138_v0 = vld [vmem:[%s1596_s8] sm:$0xff]  ;;  %s1445_s29 = smov 32   ;;  %s1446_s9 = smov 48   ;;  %v3010_v32 = vlaneseq }
  0x50   : > { %v143_v1 = vsel %vm142_vm0, %v138_v0, 0.0  ;;  %v140_v2 = vcombine.high %v138_v0, %v138_v0  ;;  %v159_v21 = vsel %vm142_vm0, %v138_v0, -inf  ;;  %s1447_s10 = smov 16   ;;  %s1448_s11 = smov 112  }
  0x51   : > { %v144_v3 = vrot.slane %v143_v1, 4  ;;  %v160_v25 = vrot.slane %v159_v21, 4  ;;  %s1449_s12 = smov 96   ;;  %s1450_s13 = smov 80   ;;  %v1712_v33 = vand.u32 127, %v3010_v32 }
  0x52   : > { %v166_v4 = vsel %vm142_vm0, %v140_v2, -inf  ;;  %v150_v5 = vsel %vm142_vm0, %v140_v2, 0.0  ;;  %s1639_s14 = sld [smem:[#allocation3 + $0x7]]  ;;  %s1641_s15 = sld [smem:[#allocation3 + $0x8]] }
  0x53   : > { %v145_v6 = vadd.f32 %v144_v3, %v143_v1  ;;  %v167_v7 = vrot.slane %v166_v4, 4  ;;  %v151_v8 = vrot.slane %v150_v5, 4  ;;  %v161_v27 = vmax.f32 %v159_v21, %v160_v25  ;;  %s1643_s16 = sld [smem:[#allocation3 + $0x9]]  ;;  %s1645_s17 = sld [smem:[#allocation3 + $0xa]]  ;;  %3124 = vst [vmem:[#allocation59_spill] sm:$0xff] %v1712_v33 }
  0x54   : > { %s1647_s18 = sld [smem:[#allocation3 + $0xb]]  ;;  %s1649_s23 = sld [smem:[#allocation3 + $0xc]]  ;;  %v1731_v34 = vadd.s32 4294967264, %v1712_v33  ;;  %v1734_v35 = vadd.s32 128, %v1712_v33  ;;  %v1752_v43 = vadd.s32 4294967280, %v1712_v33  ;;  %v1797_v62 = vadd.s32 4294967248, %v1712_v33 }
  0x55   : > { %v146_v9 = vrot.slane %v145_v6, 2  ;;  %v168_v10 = vmax.f32 %v166_v4, %v167_v7  ;;  %v152_v11 = vadd.f32 %v151_v8, %v150_v5  ;;  %v162_v28 = vrot.slane %v161_v27, 2  ;;  %s1651_s25 = sld [smem:[#allocation3 + $0xd]]  ;;  %s1653_s26 = sld [smem:[#allocation3 + $0xe]] }
  0x56   : > { %s1655_s28 = sld [smem:[#allocation3 + $0xf]]  ;;  %s1657_s4 = sld [smem:[#allocation3 + $0x10]]  ;;  %3130 = vst [vmem:[#allocation65_spill] sm:$0xff] %v1731_v34  ;;  %3131 = vst [vmem:[#allocation66_spill] sm:$0xff] %v1734_v35  ;;  %v1770_v51 = vadd.s32 16, %v1734_v35  ;;  %v1788_v59 = vadd.s32 32, %v1734_v35 }
  0x57   : > { %v147_v12 = vadd.f32 %v146_v9, %v145_v6  ;;  %v169_v13 = vrot.slane %v168_v10, 2  ;;  %v153_v14 = vrot.slane %v152_v11, 2  ;;  %v163_v29 = vmax.f32 %v161_v27, %v162_v28  ;;  %s1659_s7 = sld [smem:[#allocation3 + $0x11]]  ;;  %s1673_s6 = sld [smem:[#allocation3 + $0x1f]]  ;;  %3135 = vst [vmem:[#allocation70_spill] sm:$0xff] %v1752_v43  ;;  %3153 = vst [vmem:[#allocation78_spill] sm:$0xff] %v1797_v62 }
  0x58   : > { %3089 = sst [smem:[#allocation24_spill]] %s1639_s14  ;;  %s1675_s1 = sld [smem:[#allocation3 + $0x20]]  ;;  %v405_v36 = vstv %s1639_s14  ;;  %v500_v37 = vstv %s1641_s15  ;;  %3139 = vst [vmem:[#allocation73_spill] sm:$0xff] %v1770_v51  ;;  %3147 = vst [vmem:[#allocation76_spill] sm:$0xff] %v1788_v59  ;;  %vm309_vm1 = vcmp.lt.s32.totalorder %v1712_v33, 32  ;;  %vm226_vm2 = vcmp.ge.s32.totalorder %v1731_v34, 0 }
  0x59   : > { %v148_v15 = vrot.slane %v147_v12, 1  ;;  %v170_v16 = vmax.f32 %v168_v10, %v169_v13  ;;  %v154_v17 = vadd.f32 %v153_v14, %v152_v11  ;;  %v164_v30 = vrot.slane %v163_v29, 1  ;;  %3090 = sst [smem:[#allocation25_spill]] %s1641_s15  ;;  %s1677_s27 = sld [smem:[#allocation3 + $0x21]] }
  0x5a   : > { %3091 = sst [smem:[#allocation26_spill]] %s1643_s16  ;;  %s1679_s21 = sld [smem:[#allocation3 + $0x22]]  ;;  %v595_v38 = vstv %s1643_s16  ;;  %v690_v39 = vstv %s1645_s17  ;;  %v776_v40 = vstv %s1647_s18  ;;  %v871_v41 = vstv %s1649_s23 }
  0x5b   : > { %v149_v18 = vadd.f32 %v148_v15, %v147_v12  ;;  %v171_v19 = vrot.slane %v170_v16, 1  ;;  %v155_v20 = vrot.slane %v154_v17, 1  ;;  %v1625_v31 = vmax.f32 %v163_v29, %v164_v30  ;;  %3092 = sst [smem:[#allocation27_spill]] %s1645_s17  ;;  %s1681_s20 = sld [smem:[#allocation3 + $0x23]] }
  0x5c   : > { %3093 = sst [smem:[#allocation28_spill]] %s1647_s18  ;;  %s1683_s24 = sld [smem:[#allocation3 + $0x24]]  ;;  %v966_v42 = vstv %s1651_s25  ;;  %v3052_v44 = vstv %s1653_s26  ;;  %v3053_v45 = vstv %s1655_s28  ;;  %vm318_vm3 = vcmp.lt.s32.totalorder %v1712_v33, 16 }
  0x5d   : > { %v1607_v22 = vmul.f32 0.25, %v149_v18  ;;  %v1611_v23 = vmax.f32 %v170_v16, %v171_v19  ;;  %v156_v24 = vadd.f32 %v155_v20, %v154_v17  ;;  %3088 = vst [vmem:[#allocation23_spill] sm:$0xff] %v1625_v31  ;;  %3094 = sst [smem:[#allocation29_spill]] %s1649_s23  ;;  %s1685_s22 = sld [smem:[#allocation3 + $0x25]]  ;;  %vm242_vm4 = vcmp.ge.s32.totalorder %v1752_v43, 0 }
  0x5e   : > { %3095 = sst [smem:[#allocation30_spill]] %s1651_s25  ;;  %s1687_s3 = sld [smem:[#allocation3 + $0x26]]  ;;  %vm327_vm5 = vcmp.lt.s32.totalorder %v1712_v33, 112  ;;  %vm261_vm6 = vcmp.lt.s32.totalorder %v1770_v51, 256  ;;  %vm336_vm7 = vcmp.lt.s32.totalorder %v1712_v33, 96  ;;  %vm277_vm8 = vcmp.lt.s32.totalorder %v1788_v59, 256 }
  0x5f   : > { %305 = vrot.lane.b32.xlu1 %v1607_v22, %s1445_s29  ;;  %296 = vrot.lane.b32.xlu0 %v1607_v22, %s1446_s9  ;;  %3087 = vst [vmem:[#allocation22_spill] sm:$0xff] %v1611_v23  ;;  %v1615_v26 = vmul.f32 0.25, %v156_v24  ;;  %3096 = sst [smem:[#allocation31_spill]] %s1653_s26  ;;  %s1689_s19 = sld [smem:[#allocation3 + $0x27]]  ;;  %vm300_vm9 = vcmp.lt.s32.totalorder %v1712_v33, 48  ;;  %vm210_vm10 = vcmp.ge.s32.totalorder %v1797_v62, 0 }
  0x60   : > { %3097 = sst [smem:[#allocation32_spill]] %s1655_s28  ;;  %s1691_s2 = sld [smem:[#allocation3 + $0x28]]  ;;  %vm345_vm11 = vcmp.lt.s32.totalorder %v1712_v33, 80 }
  0x61   : > { %3098 = sst [smem:[#allocation33_spill]] %s1657_s4  ;;  %s1693_s30 = sld [smem:[#allocation3 + $0x29]] }
  0x62   : > { %3099 = sst [smem:[#allocation34_spill]] %s1659_s7  ;;  %s1695_s8 = sld [smem:[#allocation3]] }
  0x63   : > { %314 = vrot.lane.b32.xlu0 %v1607_v22, %s1447_s10  ;;  %352 = vrot.lane.b32.xlu1 %v1611_v23, %s1446_s9  ;;  %3106 = sst [smem:[#allocation41_spill]] %s1673_s6  ;;  %s1697_s5 = sld [smem:[#allocation3 + $0x15]] }
  0x64   : > { %3107 = sst [smem:[#allocation42_spill]] %s1675_s1  ;;  %s1699_s0 = sld [smem:[#allocation3 + $0x1]] }
  0x65   : > { %3108 = sst [smem:[#allocation43_spill]] %s1677_s27  ;;  %s1756_s16 = sld [smem:[#allocation3 + $0x31]] }
  0x66   : > { %3109 = sst [smem:[#allocation44_spill]] %s1679_s21  ;;  %s1762_s18 = sld [smem:[#allocation3 + $0x32]] }
  0x67   : > { %323 = vrot.lane.b32.xlu0 %v1607_v22, %s1448_s11  ;;  %307 = vrot.lane.b32.xlu1 %v1615_v26, %s1445_s29  ;;  %3110 = sst [smem:[#allocation45_spill]] %s1681_s20  ;;  %s1701_s20 = sld [smem:[#allocation3 + $0x16]] }
  0x68   : > { %3111 = sst [smem:[#allocation46_spill]] %s1683_s24  ;;  %s1703_s24 = sld [smem:[#allocation3 + $0x2]] }
  0x69   : > { %3112 = sst [smem:[#allocation47_spill]] %s1685_s22  ;;  %s1705_s22 = sld [smem:[#allocation3 + $0x17]]  ;;  %v417_v63 = vstv %s1697_s5 }
  0x6a   : > { %3113 = sst [smem:[#allocation48_spill]] %s1687_s3  ;;  %s1707_s3 = sld [smem:[#allocation3 + $0x3]]  ;;  %v1821_v8 = vmul.f32 %v417_v63, %v1607_v22  ;;  %v1846_v19 = vmul.f32 %v417_v63, %v1615_v26 }
  0x6b   : > { %332 = vrot.lane.b32.xlu0 %v1607_v22, %s1449_s12  ;;  %316 = vrot.lane.b32.xlu1 %v1615_v26, %s1447_s10  ;;  %3114 = sst [smem:[#allocation49_spill]] %s1689_s19  ;;  %s1764_s25 = sld [smem:[#allocation3 + $0x33]] }
  0x6c   : > { %3115 = sst [smem:[#allocation50_spill]] %s1691_s2  ;;  %s1709_s2 = sld [smem:[#allocation3 + $0x18]] }
  0x6d   : > { %3116 = sst [smem:[#allocation51_spill]] %s1693_s30  ;;  %s1718_s30 = sld [smem:[#allocation3 + $0x5]] }
  0x6e   : > { %3117 = sst [smem:[#allocation52_spill]] %s1695_s8  ;;  %s1714_s8 = sld [smem:[#allocation3 + $0x4]] }
  0x6f   : > { %341 = vrot.lane.b32.xlu0 %v1607_v22, %s1450_s13  ;;  %325 = vrot.lane.b32.xlu1 %v1615_v26, %s1448_s11  ;;  %3118 = sst [smem:[#allocation53_spill]] %s1699_s0  ;;  %s1716_s0 = sld [smem:[#allocation3 + $0x19]] }
  0x70   : > { %3119 = sst [smem:[#allocation54_spill]] %s1701_s20  ;;  %s1772_s15 = sld [smem:[#allocation3 + $0x34]] }
  0x71   : > { %3120 = sst [smem:[#allocation55_spill]] %s1703_s24  ;;  %s1720_s24 = sld [smem:[#allocation3 + $0x1a]] }
  0x72   : > { %3121 = sst [smem:[#allocation56_spill]] %s1705_s22  ;;  %s1722_s22 = sld [smem:[#allocation3 + $0x6]] }
  0x73   : > { %334 = vrot.lane.b32.xlu1 %v1615_v26, %s1449_s12  ;;  %298 = vrot.lane.b32.xlu0 %v1615_v26, %s1446_s9  ;;  %3122 = sst [smem:[#allocation57_spill]] %s1707_s3  ;;  %s1724_s3 = sld [smem:[#allocation3 + $0x1b]] }
  0x74   : > { %3123 = sst [smem:[#allocation58_spill]] %s1709_s2  ;;  %s1726_s2 = sld [smem:[#allocation3 + $0x2a]] }
  0x75   : > { %3125 = sst [smem:[#allocation60_spill]] %s1714_s8  ;;  %s1728_s20 = sld [smem:[#allocation3 + $0x2b]]  ;;  %v788_v11 = vstv %s1716_s0 }
  0x76   : > { %3126 = sst [smem:[#allocation61_spill]] %s1718_s30  ;;  %s1736_s30 = sld [smem:[#allocation3 + $0x2c]]  ;;  %v1856_v21 = vmul.f32 %v788_v11, %v1607_v22 }
  0x77   : > { %343 = vrot.lane.b32.xlu1 %v1615_v26, %s1450_s13  ;;  %350 = vrot.lane.b32.xlu0 %v1625_v31, %s1446_s9  ;;  %s1663_s9 = sld [smem:[#allocation3 + $0x13]]  ;;  %s1738_s8 = sld [smem:[#allocation3 + $0x2d]]  ;;  %v883_v15 = vstv %s1720_s24 }
  0x78   : > { %3127 = sst [smem:[#allocation62_spill]] %s1722_s22  ;;  %s1774_s28 = sld [smem:[#allocation3 + $0x35]]  ;;  %3167 = vst [vmem:[#allocation83_spill] sm:$0xff] %v1856_v21  ;;  %v1867_v27 = vmul.f32 %v883_v15, %v1607_v22 }
  0x79   : > { %3136 = sst [smem:[#allocation71_spill]] %s1762_s18  ;;  %s1780_s26 = sld [smem:[#allocation3 + $0x36]]  ;;  %v978_v18 = vstv %s1724_s3 }
  0x7a   : > { %3128 = sst [smem:[#allocation63_spill]] %s1726_s2  ;;  %s1746_s2 = sld [smem:[#allocation3 + $0x2f]]  ;;  %3169 = vst [vmem:[#allocation84_spill] sm:$0xff] %v1867_v27  ;;  %v1881_v63 = vmul.f32 %v978_v18, %v1607_v22 }
  0x7b   : > { %360 = vrot.lane.b32.xlu1 %v1611_v23, %s1445_s29  ;;  %358 = vrot.lane.b32.xlu0 %v1625_v31, %s1445_s29  ;;  %s1661_s29 = sld [smem:[#allocation3 + $0x12]]  ;;  %3129 = sst [smem:[#allocation64_spill]] %s1728_s20 }
  0x7c   : > { %3132 = sst [smem:[#allocation67_spill]] %s1736_s30  ;;  %s1744_s20 = sld [smem:[#allocation3 + $0x2e]]  ;;  %3173 = vst [vmem:[#allocation87_spill] sm:$0xff] %v1881_v63 }
  0x7d   : > { %3101 = sst [smem:[#allocation36_spill]] %s1663_s9  ;;  %s3145_s9 = sld [smem:[#allocation54_spill]] }
  0x7e   : > { %3133 = sst [smem:[#allocation68_spill]] %s1738_s8  ;;  %s1754_s8 = sld [smem:[#allocation3 + $0x30]] }
  0x7f   : > { %368 = vrot.lane.b32.xlu1 %v1611_v23, %s1447_s10  ;;  %366 = vrot.lane.b32.xlu0 %v1625_v31, %s1447_s10  ;;  %s1665_s10 = sld [smem:[#allocation3 + $0x14]]  ;;  %3137 = sst [smem:[#allocation72_spill]] %s1764_s25 }
  0x80   : > { %3143 = sst [smem:[#allocation74_spill]] %s1780_s26  ;;  %s3152_s6 = sld [smem:[#allocation56_spill]] }
  0x81   : > { %3100 = sst [smem:[#allocation35_spill]] %s1661_s29  ;;  %s1800_s27 = sld [smem:[#allocation3 + $0x3a]] }
  0x82   : > { %3134 = sst [smem:[#allocation69_spill]] %s1744_s20  ;;  %s1810_s17 = sld [smem:[#allocation3 + $0x3d]] }
  0x83   : > { %376 = vrot.lane.b32.xlu1 %v1611_v23, %s1448_s11  ;;  %374 = vrot.lane.b32.xlu0 %v1625_v31, %s1448_s11  ;;  %s1667_s11 = sld [smem:[#allocation3 + $0x1c]]  ;;  %s3156_s21 = sld [smem:[#allocation58_spill]]  ;;  %v512_v3 = vstv %s3145_s9 }
  0x84   : > { %s1826_s9 = sld [smem:[#allocation3 + $0x4d]]  ;;  %s1828_s4 = sld [smem:[#allocation3 + $0x40]]  ;;  %v1831_v12 = vmul.f32 %v512_v3, %v1607_v22  ;;  %v1860_v25 = vmul.f32 %v512_v3, %v1615_v26  ;;  %v1884_v3 = vmul.f32 %v788_v11, %v1615_v26 }
  0x85   : > { %3102 = sst [smem:[#allocation37_spill]] %s1665_s10  ;;  %s1782_s10 = sld [smem:[#allocation3 + $0x37]] }
  0x86   : > { %v607_v7 = vstv %s3152_s6  ;;  %s1836_s6 = sld [smem:[#allocation3 + $0x46]]  ;;  %s1838_s14 = sld [smem:[#allocation3 + $0x41]]  ;;  %3174 = vst [vmem:[#allocation88_spill] sm:$0xff] %v1884_v3 }
  0x87   : > { %384 = vrot.lane.b32.xlu1 %v1611_v23, %s1449_s12  ;;  %382 = vrot.lane.b32.xlu0 %v1625_v31, %s1449_s12  ;;  %s1669_s12 = sld [smem:[#allocation3 + $0x1d]]  ;;  %v1841_v16 = vmul.f32 %v607_v7, %v1607_v22  ;;  %s1850_s0 = sld [smem:[#allocation3 + $0x4e]]  ;;  %v1871_v29 = vmul.f32 %v607_v7, %v1615_v26  ;;  %v1887_v7 = vadd.s32 48, %v1734_v35 }
  0x88   : > { %3155 = sst [smem:[#allocation56_spill]] %s1800_s27  ;;  %s1816_s27 = sld [smem:[#allocation3 + $0x3e]] }
  0x89   : > { %3103 = sst [smem:[#allocation38_spill]] %s1667_s11  ;;  %s1790_s11 = sld [smem:[#allocation3 + $0x38]]  ;;  %v702_v10 = vstv %s3156_s21  ;;  %vm293_vm12 = vcmp.lt.s32.totalorder %v1887_v7, 256 }
  0x8a   : > { %3162 = sst [smem:[#allocation80_spill]] %s1826_s9  ;;  %s1848_s21 = sld [smem:[#allocation3 + $0x54]]  ;;  %v1853_v20 = vmul.f32 %v702_v10, %v1607_v22  ;;  %v1874_v30 = vmul.f32 %v702_v10, %v1615_v26  ;;  %v1895_v10 = vmul.f32 %v883_v15, %v1615_v26  ;;  %v1898_v22 = vmul.f32 %v978_v18, %v1615_v26 }
  0x8b   : > { %392 = vrot.lane.b32.xlu1 %v1611_v23, %s1450_s13  ;;  %390 = vrot.lane.b32.xlu0 %v1625_v31, %s1450_s13  ;;  %s1671_s13 = sld [smem:[#allocation3 + $0x1e]]  ;;  %3144 = sst [smem:[#allocation75_spill]] %s1782_s10 }
  0x8c   : > { %s1802_s10 = sld [smem:[#allocation3 + $0x3b]]  ;;  %3164 = sst [smem:[#allocation81_spill]] %s1828_s4  ;;  %3176 = vst [vmem:[#allocation90_spill] sm:$0xff] %v1895_v10  ;;  %3177 = vst [vmem:[#allocation91_spill] sm:$0xff] %v1898_v22  ;;  %v459_v17 = vstv %s1836_s6 }
  0x8d   : > { %3104 = sst [smem:[#allocation39_spill]] %s1669_s12  ;;  %s1792_s12 = sld [smem:[#allocation3 + $0x39]]  ;;  %v1958_v26 = vmul.f32 %v459_v17, %v1625_v31  ;;  %v1970_v9 = vmul.f32 %v459_v17, %v1611_v23 }
  0x8e   : > { %3161 = sst [smem:[#allocation79_spill]] %s1816_s27  ;;  %s1862_s24 = sld [smem:[#allocation3 + $0x47]] }
  0x8f   : > { %3149 = sst [smem:[#allocation54_spill]] %s1790_s11  ;;  %s1864_s5 = sld [smem:[#allocation3 + $0x55]]  ;;  %3191 = vst [vmem:[#allocation97_spill] sm:$0xff] %v1958_v26  ;;  %3197 = vst [vmem:[#allocation99_spill] sm:$0xff] %v1970_v9 }
  0x90   : > { %3165 = sst [smem:[#allocation82_spill]] %s1838_s14  ;;  %s1876_s19 = sld [smem:[#allocation3 + $0x4f]] }
  0x91   : > { %3105 = sst [smem:[#allocation40_spill]] %s1671_s13  ;;  %s1878_s1 = sld [smem:[#allocation3 + $0x43]] }
  0x92   : > { %3157 = sst [smem:[#allocation58_spill]] %s1802_s10  ;;  %s1890_s22 = sld [smem:[#allocation3 + $0x5b]] }
  0x93   : > { %3151 = sst [smem:[#allocation77_spill]] %s1792_s12  ;;  %s1818_s10 = sld [smem:[#allocation3 + $0x3f]] }
  0x94   : > { %s1808_s12 = sld [smem:[#allocation3 + $0x3c]]  ;;  %s1892_s13 = sld [smem:[#allocation3 + $0x48]]  ;;  %v554_v14 = vstv %s1862_s24 }
  0x95   : > { %s1902_s29 = sld [smem:[#allocation3 + $0x5c]]  ;;  %s1904_s23 = sld [smem:[#allocation3 + $0x56]]  ;;  %v1973_v11 = vmul.f32 %v554_v14, %v1625_v31  ;;  %v1984_v4 = vmul.f32 %v554_v14, %v1611_v23 }
  0x96   : > { %3171 = sst [smem:[#allocation85_spill]] %s1876_s19  ;;  %s1919_s11 = sld [smem:[#allocation3 + $0x5d]] }
  0x97   : > { %3172 = sst [smem:[#allocation86_spill]] %s1878_s1  ;;  %s1912_s19 = sld [smem:[#allocation3 + $0x51]]  ;;  %3198 = vst [vmem:[#allocation100_spill] sm:$0xff] %v1973_v11  ;;  %3201 = vst [vmem:[#allocation102_spill] sm:$0xff] %v1984_v4 }
  0x98   : > { %3175 = sst [smem:[#allocation89_spill]] %s1890_s22  ;;  %s1910_s22 = sld [smem:[#allocation3 + $0x4a]] }
  0x99   : > { %s1921_s20 = sld [smem:[#allocation3 + $0x44]]  ;;  %s1928_s18 = sld [smem:[#allocation3 + $0x58]] }
  0x9a   : > { %s1930_s25 = sld [smem:[#allocation3 + $0x4b]]  ;;  %s1938_s26 = sld [smem:[#allocation3 + $0x45]]  ;;  %v649_v13 = vstv %s1892_s13 }
  0x9b   : > { %3178 = sst [smem:[#allocation92_spill]] %s1902_s29  ;;  %s1946_s7 = sld [smem:[#allocation3 + $0x52]]  ;;  %v1990_v28 = vmul.f32 %v649_v13, %v1625_v31  ;;  %v1994_v0 = vmul.f32 %v649_v13, %v1611_v23 }
  0x9c   : > { %s1940_s1 = sld [smem:[#allocation3 + $0x4c]]  ;;  %s3187_s30 = sld [smem:[#allocation85_spill]] }
  0x9d   : > { %s1952_s6 = sld [smem:[#allocation3 + $0x5f]]  ;;  %s1954_s3 = sld [smem:[#allocation3 + $0x59]]  ;;  %3202 = vst [vmem:[#allocation103_spill] sm:$0xff] %v1990_v28  ;;  %3203 = vst [vmem:[#allocation104_spill] sm:$0xff] %v1994_v0 }
  0x9e   : > { %s3190_s29 = sld [smem:[#allocation89_spill]]  ;;  %s3192_s24 = sld [smem:[#allocation86_spill]]  ;;  %v830_v2 = vstv %s1910_s22 }
  0x9f   : > { %3184 = sst [smem:[#allocation93_spill]] %s1921_s20  ;;  %s3193_s27 = sld [smem:[#allocation92_spill]]  ;;  %v2003_v1 = vmul.f32 %v830_v2, %v1625_v31  ;;  %v2013_v14 = vmul.f32 %v830_v2, %v1611_v23 }
  0xa0   : > { %3185 = sst [smem:[#allocation94_spill]] %s1938_s26  ;;  %s1963_s9 = sld [smem:[#allocation3 + $0x60]]  ;;  %v925_v17 = vstv %s1930_s25 }
  0xa1   : > { %3186 = sst [smem:[#allocation95_spill]] %s1946_s7  ;;  %s1965_s4 = sld [smem:[#allocation3 + $0x53]]  ;;  %3204 = vst [vmem:[#allocation105_spill] sm:$0xff] %v2003_v1  ;;  %3206 = vst [vmem:[#allocation106_spill] sm:$0xff] %v2013_v14  ;;  %v2020_v24 = vmul.f32 %v925_v17, %v1625_v31  ;;  %v2026_v2 = vmul.f32 %v925_v17, %v1611_v23 }
  0xa2   : > { %s1977_s13 = sld [smem:[#allocation3 + $0x5a]]  ;;  %s1979_s14 = sld [smem:[#allocation3 + $0x61]]  ;;  %v1020_v57 = vstv %s1940_s1 }
  0xa3   : > { %3188 = sst [smem:[#allocation85_spill]] %s1952_s6  ;;  %3208 = vst [vmem:[#allocation107_spill] sm:$0xff] %v2020_v24  ;;  %3211 = vst [vmem:[#allocation108_spill] sm:$0xff] %v2026_v2  ;;  %v2039_v17 = vmul.f32 %v1020_v57, %v1611_v23  ;;  %s3219_s22 = sld [smem:[#allocation33_spill]] }
  0xa4   : > { %3189 = sst [smem:[#allocation96_spill]] %s1954_s3  ;;  %s3222_s1 = sld [smem:[#allocation36_spill]] }
  0xa5   : > { %3216 = vst [vmem:[#allocation110_spill] sm:$0xff] %v2039_v17  ;;  %s3221_s25 = sld [smem:[#allocation35_spill]]  ;;  %s3224_s26 = sld [smem:[#allocation37_spill]] }
  0xa6   : > { %3194 = sst [smem:[#allocation89_spill]] %s1963_s9  ;;  %s3229_s9 = sld [smem:[#allocation39_spill]] }
  0xa7   : > { %3195 = sst [smem:[#allocation86_spill]] %s1965_s4  ;;  %s3220_s4 = sld [smem:[#allocation34_spill]] }
  0xa8   : > { %3199 = sst [smem:[#allocation92_spill]] %s1977_s13  ;;  %s3227_s7 = sld [smem:[#allocation38_spill]] }
  0xa9   : > { %3200 = sst [smem:[#allocation101_spill]] %s1979_s14  ;;  %s3217_s13 = sld [smem:[#allocation31_spill]]  ;;  %v3223_v35 = vstv %s3219_s22  ;;  %v3233_v14 = vstv %s3219_s22 }
  0xaa   : > { %s3218_s14 = sld [smem:[#allocation32_spill]]  ;;  %s3234_s20 = sld [smem:[#allocation41_spill]] }
  0xab   : > { %s3230_s3 = sld [smem:[#allocation40_spill]]  ;;  %s3236_s6 = sld [smem:[#allocation42_spill]]  ;;  %v3237_v4 = vstv %s3221_s25 }
  0xac   : > { %s3253_s22 = sld [smem:[#allocation46_spill]] }
  0xad   : > { %v3235_v0 = vstv %s3220_s4 }
  0xb1   : > { %v3262_v22 = vstv %s3236_s6  ;;  %s3283_s6 = sld [smem:[#allocation57_spill]] }
  0xb2   : > { %v3280_v59 = vstv %s3253_s22 }
  0xb7   : > { %v3301_v21 = vstv %s3283_s6  ;;  %s3373_s6 = sld [smem:[#allocation75_spill]] }
  0xb8   : > { %v3302_v62 = vmov %v3301_v21 }
  0xd1   : > { %v306_v18 = vpop.permute.xlu1 %305  ;;  %v1932_v15 = vpop.permute.xlu0 %296 }
  0xd5   : > { %v315_v32 = vpop.permute.xlu0 %314  ;;  %v1967_v5 = vpop.permute.xlu1 %352 }
  0xd6   : > { %3196 = vst [vmem:[#allocation98_spill] sm:$0xff] %v1967_v5 }
  0xd9   : > { %v324_v60 = vpop.permute.xlu0 %323  ;;  %v308_v58 = vpop.permute.xlu1 %307 }
  0xda   : > { %v310_v6 = vsel %vm309_vm1, %v306_v18, %v308_v58  ;;  %v311_v61 = vsel %vm309_vm1, %v308_v58, %v306_v18  ;;  %v2029_v18 = vmul.f32 %v1020_v57, %v1625_v31 }
  0xdb   : > { %v312_v55 = vsel %vm226_vm2, %v311_v61, 0.0  ;;  %v2034_v56 = vmul.f32 %v405_v36, %v310_v6  ;;  %v2051_v50 = vmul.f32 %v500_v37, %v310_v6  ;;  %v2055_v49 = vmul.f32 %v595_v38, %v310_v6 }
  0xdc   : > { %3212 = vst [vmem:[#allocation109_spill] sm:$0xff] %v2029_v18  ;;  %v2043_v52 = vmul.f32 %v405_v36, %v312_v55  ;;  %v2047_v61 = vmul.f32 %v500_v37, %v312_v55  ;;  %v2060_v57 = vmul.f32 %v595_v38, %v312_v55  ;;  %v2064_v36 = vmul.f32 %v690_v39, %v312_v55 }
  0xdd   : > { %v333_v13 = vpop.permute.xlu0 %332  ;;  %v317_v54 = vpop.permute.xlu1 %316  ;;  %v2072_v53 = vmul.f32 %v690_v39, %v310_v6  ;;  %v2076_v48 = vmul.f32 %v776_v40, %v312_v55  ;;  %v2080_v38 = vmul.f32 %v776_v40, %v310_v6  ;;  %v2084_v47 = vmul.f32 %v871_v41, %v312_v55 }
  0xde   : > { %v319_v58 = vsel %vm318_vm3, %v315_v32, %v317_v54  ;;  %v320_v37 = vsel %vm318_vm3, %v317_v54, %v315_v32  ;;  %v2088_v46 = vmul.f32 %v871_v41, %v310_v6  ;;  %v2092_v32 = vmul.f32 %v966_v42, %v312_v55 }
  0xdf   : > { %v2096_v39 = vmul.f32 %v966_v42, %v310_v6  ;;  %v321_v54 = vsel %vm242_vm4, %v320_v37, 0.0  ;;  %v2103_v41 = vmul.f32 %v3052_v44, %v319_v58  ;;  %v2107_v55 = vmul.f32 %v3053_v45, %v319_v58 }
  0xe0   : > { %v2111_v42 = vmul.f32 %v3223_v35, %v319_v58  ;;  %v3225_v6 = vstv %s3220_s4  ;;  %v3226_v37 = vstv %s3221_s25  ;;  %v3228_v44 = vstv %s3222_s1  ;;  %s3246_s4 = sld [smem:[#allocation44_spill]]  ;;  %s3255_s25 = sld [smem:[#allocation47_spill]] }
  0xe1   : > { %v326_v40 = vpop.permute.xlu1 %325  ;;  %v2115_v23 = vmul.f32 %v3225_v6, %v319_v58  ;;  %v2120_v31 = vmul.f32 %v3226_v37, %v319_v58  ;;  %v2124_v17 = vmul.f32 %v3228_v44, %v319_v58  ;;  %v2126_v45 = vpop.permute.xlu0 %341  ;;  %v3231_v18 = vstv %s3217_s13  ;;  %s3250_s13 = sld [smem:[#allocation45_spill]] }
  0xe2   : > { %v328_v35 = vsel %vm327_vm5, %v324_v60, %v326_v40  ;;  %v329_v6 = vsel %vm327_vm5, %v326_v40, %v324_v60  ;;  %v412_v2 = vmul.f32 %v3231_v18, %v321_v54  ;;  %v3232_v37 = vstv %s3218_s14  ;;  %s3240_s14 = sld [smem:[#allocation43_spill]] }
  0xe3   : > { %v2136_v24 = vmul.f32 %v3232_v37, %v321_v54  ;;  %v2140_v44 = vmul.f32 %v3233_v14, %v321_v54  ;;  %v331_v1 = vsel %vm261_vm6, %v329_v6, 0.0  ;;  %v697_v28 = vmul.f32 %v3235_v0, %v321_v54 }
  0xe4   : > { %v2148_v11 = vmul.f32 %v3237_v4, %v321_v54  ;;  %v3238_v60 = vstv %s3222_s1  ;;  %v3239_v18 = vstv %s3224_s26  ;;  %v3242_v6 = vstv %s3227_s7  ;;  %s3257_s1 = sld [smem:[#allocation48_spill]]  ;;  %s3260_s26 = sld [smem:[#allocation49_spill]] }
  0xe5   : > { %v2152_v40 = vmul.f32 %v3238_v60, %v321_v54  ;;  %v2156_v37 = vmul.f32 %v3239_v18, %v321_v54  ;;  %v335_v14 = vpop.permute.xlu1 %334  ;;  %v3241_v9 = vmov %v3239_v18  ;;  %v2164_v51 = vmul.f32 %v3242_v6, %v328_v35  ;;  %s3263_s7 = sld [smem:[#allocation50_spill]] }
  0xe6   : > { %v2160_v26 = vmul.f32 %v3241_v9, %v319_v58  ;;  %v3243_v0 = vstv %s3229_s9  ;;  %v3245_v4 = vstv %s3230_s3  ;;  %v3248_v34 = vmov %v3242_v6  ;;  %s3272_s9 = sld [smem:[#allocation53_spill]]  ;;  %s3274_s3 = sld [smem:[#allocation55_spill]] }
  0xe7   : > { %v2168_v43 = vmul.f32 %v3243_v0, %v328_v35  ;;  %v2172_v60 = vmul.f32 %v3245_v4, %v328_v35  ;;  %v2176_v54 = vmul.f32 %v3248_v34, %v331_v1  ;;  %v3249_v18 = vmov %v3243_v0 }
  0xe8   : > { %v2180_v5 = vmul.f32 %v3249_v18, %v331_v1  ;;  %v3252_v9 = vmov %v3245_v4  ;;  %v2188_v6 = vsel %vm336_vm7, %v333_v13, %v335_v14  ;;  %v3256_v0 = vstv %s3234_s20  ;;  %s3271_s20 = sld [smem:[#allocation52_spill]] }
  0xe9   : > { %3244 = vst [vmem:[#allocation111_spill] sm:$0xff] %v2168_v43  ;;  %3247 = vst [vmem:[#allocation112_spill] sm:$0xff] %v2172_v60  ;;  %v2184_v58 = vmul.f32 %v3252_v9, %v331_v1  ;;  %v2192_v4 = vmul.f32 %v3256_v0, %v328_v35  ;;  %v3259_v60 = vmov %v3256_v0  ;;  %v2200_v18 = vmul.f32 %v3262_v22, %v328_v35 }
  0xea   : > { %3251 = vst [vmem:[#allocation113_spill] sm:$0xff] %v2180_v5  ;;  %v2196_v34 = vmul.f32 %v3259_v60, %v331_v1  ;;  %v338_v9 = vsel %vm336_vm7, %v335_v14, %v333_v13  ;;  %v3267_v0 = vstv %s3240_s14  ;;  %v3273_v13 = vstv %s3246_s4  ;;  %s3306_s14 = sld [smem:[#allocation60_spill]]  ;;  %s3308_s4 = sld [smem:[#allocation61_spill]] }
  0xeb   : > { %3254 = vst [vmem:[#allocation114_spill] sm:$0xff] %v2184_v58  ;;  %3258 = vst [vmem:[#allocation115_spill] sm:$0xff] %v2192_v4  ;;  %v3265_v58 = vmov %v3262_v22  ;;  %v2211_v4 = vmul.f32 %v3267_v0, %v328_v35  ;;  %v3269_v10 = vmov %v3267_v0  ;;  %v2219_v22 = vsel %vm277_vm8, %v338_v9, 0.0 }
  0xec   : > { %3261 = vst [vmem:[#allocation116_spill] sm:$0xff] %v2196_v34  ;;  %3264 = vst [vmem:[#allocation117_spill] sm:$0xff] %v2200_v18  ;;  %v2207_v63 = vmul.f32 %v3265_v58, %v331_v1  ;;  %v2215_v60 = vmul.f32 %v3269_v10, %v331_v1  ;;  %v299_v18 = vpop.permute.xlu0 %298  ;;  %v2223_v14 = vmul.f32 %v3273_v13, %v328_v35  ;;  %v3276_v34 = vmov %v3273_v13 }
  0xed   : > { %3268 = vst [vmem:[#allocation119_spill] sm:$0xff] %v2211_v4  ;;  %v2227_v58 = vmul.f32 %v3276_v34, %v331_v1  ;;  %v3278_v0 = vstv %s3250_s13  ;;  %v2237_v9 = vmul.f32 %v3280_v59, %v2188_v6  ;;  %v3285_v35 = vstv %s3257_s1 }
  0xee   : > { %3266 = vst [vmem:[#allocation118_spill] sm:$0xff] %v2207_v63  ;;  %3270 = vst [vmem:[#allocation120_spill] sm:$0xff] %v2215_v60  ;;  %v2232_v10 = vmul.f32 %v3278_v0, %v2188_v6  ;;  %v3282_v60 = vstv %s3255_s25  ;;  %v2247_v13 = vmul.f32 %v3285_v35, %v2188_v6  ;;  %v3287_v1 = vstv %s3260_s26 }
  0xef   : > { %3275 = vst [vmem:[#allocation121_spill] sm:$0xff] %v2223_v14  ;;  %3277 = vst [vmem:[#allocation122_spill] sm:$0xff] %v2227_v58  ;;  %v2242_v4 = vmul.f32 %v3282_v60, %v2188_v6  ;;  %v2252_v34 = vmul.f32 %v3287_v1, %v2188_v6  ;;  %v3289_v0 = vstv %s3263_s7  ;;  %v3291_v59 = vstv %s3250_s13  ;;  %s3309_s13 = sld [smem:[#allocation62_spill]] }
  0xf0   : > { %3279 = vst [vmem:[#allocation123_spill] sm:$0xff] %v2232_v10  ;;  %3281 = vst [vmem:[#allocation124_spill] sm:$0xff] %v2237_v9  ;;  %v2257_v58 = vmul.f32 %v3289_v0, %v2188_v6  ;;  %v2262_v14 = vmul.f32 %v3291_v59, %v2219_v22  ;;  %v3293_v60 = vstv %s3253_s22  ;;  %v301_v35 = vsel %vm300_vm9, %v1932_v15, %v299_v18  ;;  %v344_v10 = vpop.permute.xlu1 %343  ;;  %s3314_s22 = sld [smem:[#allocation51_spill]] }
  0xf1   : > { %3284 = vst [vmem:[#allocation125_spill] sm:$0xff] %v2242_v4  ;;  %3286 = vst [vmem:[#allocation126_spill] sm:$0xff] %v2247_v13  ;;  %v2267_v63 = vmul.f32 %v3293_v60, %v2219_v22  ;;  %v302_v1 = vsel %vm300_vm9, %v299_v18, %v1932_v15  ;;  %v3296_v59 = vstv %s3272_s9  ;;  %v3297_v13 = vstv %s3274_s3  ;;  %s3367_s9 = sld [smem:[#allocation72_spill]]  ;;  %s3371_s3 = sld [smem:[#allocation58_spill]] }
  0xf2   : > { %3288 = vst [vmem:[#allocation127_spill] sm:$0xff] %v2252_v34  ;;  %3290 = vst [vmem:[#allocation128_spill] sm:$0xff] %v2257_v58  ;;  %v303_v0 = vsel %vm210_vm10, %v302_v1, 0.0  ;;  %v3295_v58 = vstv %s3271_s20  ;;  %v496_v4 = vmul.f32 %v3296_v59, %v301_v35  ;;  %v591_v60 = vmul.f32 %v3297_v13, %v301_v35  ;;  %s3351_s20 = sld [smem:[#allocation69_spill]] }
  0xf3   : > { %3292 = vst [vmem:[#allocation129_spill] sm:$0xff] %v2262_v14  ;;  %3294 = vst [vmem:[#allocation130_spill] sm:$0xff] %v2267_v63  ;;  %v401_v34 = vmul.f32 %v3295_v58, %v301_v35  ;;  %v3298_v63 = vmov %v3295_v58  ;;  %v3299_v27 = vmov %v3296_v59  ;;  %v3300_v43 = vmov %v3297_v13 }
  0xf4   : > { %v400_v9 = vmul.f32 %v3298_v63, %v303_v0  ;;  %v495_v5 = vmul.f32 %v3299_v27, %v303_v0  ;;  %v590_v3 = vmul.f32 %v3300_v43, %v303_v0  ;;  %v685_v15 = vmul.f32 %v3301_v21, %v303_v0 }
  0xf5   : > { %v409_v18 = vadd.f32 %v2034_v56, %v401_v34  ;;  %v504_v1 = vadd.f32 %v2051_v50, %v496_v4  ;;  %v599_v58 = vadd.f32 %v2055_v49, %v591_v60  ;;  %v686_v59 = vmul.f32 %v3302_v62, %v301_v35 }
  0xf6   : > { %v3303_v14 = vstv %s3255_s25  ;;  %v408_v63 = vadd.f32 %v2043_v52, %v400_v9  ;;  %v503_v27 = vadd.f32 %v2047_v61, %v495_v5  ;;  %v693_v43 = vadd.f32 %v2064_v36, %v685_v15  ;;  %s3318_s25 = sld [smem:[#allocation63_spill]] }
  0xf7   : > { %v2299_v13 = vmul.f32 %v3303_v14, %v2219_v22  ;;  %v3304_v21 = vstv %s3257_s1  ;;  %v3305_v50 = vstv %s3260_s26  ;;  %v415_v62 = vadd.f32 %v2103_v41, %v409_v18  ;;  %s3321_s1 = sld [smem:[#allocation64_spill]]  ;;  %s3333_s26 = sld [smem:[#allocation68_spill]] }
  0xf8   : > { %v2307_v56 = vmul.f32 %v3304_v21, %v2219_v22  ;;  %v2312_v49 = vmul.f32 %v3305_v50, %v2219_v22  ;;  %v694_v4 = vadd.f32 %v2072_v53, %v686_v59  ;;  %v3307_v52 = vstv %s3263_s7  ;;  %s3342_s7 = sld [smem:[#allocation67_spill]] }
  0xf9   : > { %v2320_v5 = vmul.f32 %v3307_v52, %v2219_v22  ;;  %v414_v61 = vadd.f32 %v412_v2, %v408_v63  ;;  %v598_v36 = vadd.f32 %v2060_v57, %v590_v3  ;;  %v699_v14 = vadd.f32 %v697_v28, %v693_v43  ;;  %v2333_v57 = vpop.permute.xlu0 %350 }
  0xfa   : > { %v510_v9 = vadd.f32 %v2107_v55, %v504_v1  ;;  %v605_v53 = vadd.f32 %v2111_v42, %v599_v58  ;;  %v700_v41 = vadd.f32 %v2115_v23, %v694_v4  ;;  %v347_v34 = vsel %vm345_vm11, %v344_v10, %v2126_v45 }
  0xfb   : > { %v420_v60 = vadd.f32 %v1821_v8, %v414_v61  ;;  %v421_v2 = vadd.f32 %v1846_v19, %v415_v62  ;;  %v509_v3 = vadd.f32 %v2136_v24, %v503_v27  ;;  %v705_v28 = vadd.f32 %v1853_v20, %v699_v14  ;;  %v2369_v61 = vpop.permute.xlu1 %360  ;;  %v3323_v14 = vld [vmem:[#allocation83_spill] sm:$0xff] }
  0xfc   : > { %v706_v55 = vadd.f32 %v1874_v30, %v700_v41  ;;  %v3310_v15 = vstv %s3306_s14  ;;  %v3312_v1 = vstv %s3308_s4  ;;  %v604_v59 = vadd.f32 %v2140_v44, %v598_v36  ;;  %v3322_v36 = vld [vmem:[#allocation129_spill] sm:$0xff]  ;;  %v3325_v41 = vld [vmem:[#allocation111_spill] sm:$0xff]  ;;  %s3378_s14 = sld [smem:[#allocation77_spill]]  ;;  %s2780_s4 = sld [smem:[#allocation3 + $0x49]] }
  0xfd   : > { %v771_v42 = vmul.f32 %v3310_v15, %v303_v0  ;;  %v3311_v18 = vmov %v3310_v15  ;;  %v866_v58 = vmul.f32 %v3312_v1, %v303_v0  ;;  %v3313_v63 = vmov %v3312_v1  ;;  %v3331_v1 = vld [vmem:[#allocation91_spill] sm:$0xff] }
  0xfe   : > { %v772_v23 = vmul.f32 %v3311_v18, %v301_v35  ;;  %v867_v8 = vmul.f32 %v3313_v63, %v301_v35  ;;  %v3315_v19 = vstv %s3309_s13  ;;  %v426_v50 = vadd.f32 %v2164_v51, %v420_v60  ;;  %s1454_s13 = smov 127  }
  0xff   : > { %v961_v43 = vmul.f32 %v3315_v19, %v303_v0  ;;  %v3316_v24 = vmov %v3315_v19  ;;  %v779_v20 = vadd.f32 %v2076_v48, %v771_v42  ;;  %v874_v30 = vadd.f32 %v2084_v47, %v866_v58  ;;  %v3329_v42 = vld [vmem:[#allocation87_spill] sm:$0xff] }
 0x100   : > { %v962_v27 = vmul.f32 %v3316_v24, %v301_v35  ;;  %v780_v21 = vadd.f32 %v2080_v38, %v772_v23  ;;  %v875_v62 = vadd.f32 %v2088_v46, %v867_v8  ;;  %v427_v52 = vadd.f32 %v2176_v54, %v421_v2  ;;  %v2371_v54 = vpop.permute.xlu0 %358  ;;  %v3327_v2 = vld [vmem:[#allocation84_spill] sm:$0xff]  ;;  %v3334_v8 = vld [vmem:[#allocation112_spill] sm:$0xff] }
 0x101   : > { %v969_v4 = vadd.f32 %v2092_v32, %v961_v43  ;;  %v515_v0 = vadd.f32 %v1831_v12, %v509_v3  ;;  %v516_v35 = vadd.f32 %v1860_v25, %v510_v9  ;;  %v785_v48 = vadd.f32 %v2148_v11, %v779_v20  ;;  %v3335_v43 = vld [vmem:[#allocation114_spill] sm:$0xff] }
 0x102   : > { %v970_v44 = vadd.f32 %v2096_v39, %v962_v27  ;;  %v786_v38 = vadd.f32 %v2120_v31, %v780_v21  ;;  %v3317_v47 = vstv %s3314_s22  ;;  %v880_v46 = vadd.f32 %v2152_v40, %v874_v30  ;;  %v3337_v30 = vld [vmem:[#allocation115_spill] sm:$0xff]  ;;  %s2810_s22 = sld [smem:[#allocation3 + $0x50]] }
 0x103   : > { %v2364_v51 = vmul.f32 %v3317_v47, %v2188_v6  ;;  %v881_v32 = vadd.f32 %v2124_v17, %v875_v62  ;;  %v975_v39 = vadd.f32 %v2156_v37, %v969_v4  ;;  %v610_v12 = vadd.f32 %v1841_v16, %v604_v59  ;;  %v3320_v6 = vld [vmem:[#allocation123_spill] sm:$0xff]  ;;  %v3338_v62 = vld [vmem:[#allocation116_spill] sm:$0xff] }
 0x104   : > { %v611_v25 = vadd.f32 %v1871_v29, %v605_v53  ;;  %v976_v31 = vadd.f32 %v2160_v26, %v970_v44  ;;  %v2379_v11 = vsel %vm345_vm11, %v2126_v45, %v344_v10  ;;  %v3319_v17 = vmov %v3317_v47  ;;  %v3324_v26 = vld [vmem:[#allocation88_spill] sm:$0xff]  ;;  %v3326_v45 = vld [vmem:[#allocation113_spill] sm:$0xff]  ;;  %v2413_v44 = vpop.permute.xlu1 %368 }
 0x105   : > { %v992_v40 = vmul.f32 %v3319_v17, %v2219_v22  ;;  %v2386_v37 = vsel %vm293_vm12, %v347_v34, 0.0  ;;  %v432_v16 = vadd.f32 %v3320_v6, %v426_v50  ;;  %v433_v29 = vadd.f32 %v3322_v36, %v427_v52  ;;  %v3328_v22 = vld [vmem:[#allocation90_spill] sm:$0xff]  ;;  %v2415_v52 = vpop.permute.xlu0 %366  ;;  %v3346_v6 = vld [vmem:[#allocation125_spill] sm:$0xff] }
 0x106   : > { %v791_v9 = vadd.f32 %v3323_v14, %v785_v48  ;;  %v792_v53 = vadd.f32 %v3324_v26, %v786_v38  ;;  %v521_v60 = vadd.f32 %v3325_v41, %v515_v0  ;;  %v522_v10 = vadd.f32 %v3326_v45, %v516_v35  ;;  %v3339_v35 = vld [vmem:[#allocation124_spill] sm:$0xff]  ;;  %v3340_v38 = vld [vmem:[#allocation130_spill] sm:$0xff] }
 0x107   : > { %v886_v3 = vadd.f32 %v3327_v2, %v880_v46  ;;  %v887_v15 = vadd.f32 %v3328_v22, %v881_v32  ;;  %v981_v34 = vadd.f32 %v3329_v42, %v975_v39  ;;  %v3330_v18 = vstv %s3318_s25  ;;  %v3343_v39 = vld [vmem:[#allocation126_spill] sm:$0xff]  ;;  %v3350_v22 = vld [vmem:[#allocation120_spill] sm:$0xff]  ;;  %s3467_s25 = sld [smem:[#allocation92_spill]] }
 0x108   : > { %v436_v23 = vmul.f32 %v3330_v18, %v2379_v11  ;;  %v982_v58 = vadd.f32 %v3331_v1, %v976_v31  ;;  %v3332_v59 = vmov %v3330_v18  ;;  %v616_v19 = vadd.f32 %v3334_v8, %v610_v12  ;;  %v3348_v26 = vld [vmem:[#allocation118_spill] sm:$0xff]  ;;  %v3354_v1 = vld [vmem:[#allocation127_spill] sm:$0xff] }
 0x109   : > { %v437_v63 = vmul.f32 %v3332_v59, %v2386_v37  ;;  %v617_v24 = vadd.f32 %v3335_v43, %v611_v25  ;;  %v3336_v20 = vstv %s3321_s1  ;;  %v711_v50 = vadd.f32 %v3337_v30, %v705_v28  ;;  %v377_v43 = vpop.permute.xlu1 %376  ;;  %v3357_v30 = vld [vmem:[#allocation128_spill] sm:$0xff]  ;;  %s3469_s1 = sld [smem:[#allocation101_spill]] }
 0x10a   : > { %v2406_v27 = vadd.f32 %v436_v23, %v432_v16  ;;  %v531_v21 = vmul.f32 %v3336_v20, %v2379_v11  ;;  %v712_v4 = vadd.f32 %v3338_v62, %v706_v55  ;;  %v527_v48 = vadd.f32 %v3339_v35, %v521_v60 }
 0x10b   : > { %v2417_v0 = vadd.f32 %v437_v63, %v433_v29  ;;  %v528_v47 = vadd.f32 %v3340_v38, %v522_v10  ;;  %v3341_v46 = vmov %v3336_v20  ;;  %v717_v12 = vadd.f32 %v3343_v39, %v711_v50  ;;  %v3347_v29 = vld [vmem:[#allocation117_spill] sm:$0xff]  ;;  %v3349_v10 = vld [vmem:[#allocation119_spill] sm:$0xff] }
 0x10c   : > { %v532_v32 = vmul.f32 %v3341_v46, %v2386_v37  ;;  %v718_v28 = vadd.f32 %v2307_v56, %v712_v4  ;;  %v3344_v55 = vstv %s3333_s26  ;;  %v622_v16 = vadd.f32 %v3346_v6, %v616_v19  ;;  %v3355_v63 = vld [vmem:[#allocation121_spill] sm:$0xff]  ;;  %v3362_v39 = vld [vmem:[#allocation98_spill] sm:$0xff]  ;;  %s2815_s26 = sld [smem:[#allocation3 + $0x57]] }
 0x10d   : > { %v721_v25 = vmul.f32 %v3344_v55, %v2379_v11  ;;  %v3345_v31 = vmov %v3344_v55  ;;  %v623_v36 = vadd.f32 %v2299_v13, %v617_v24  ;;  %v797_v14 = vadd.f32 %v3347_v29, %v791_v9  ;;  %v375_v24 = vpop.permute.xlu0 %374 }
 0x10e   : > { %v722_v17 = vmul.f32 %v3345_v31, %v2386_v37  ;;  %v798_v41 = vadd.f32 %v3348_v26, %v792_v53  ;;  %v892_v2 = vadd.f32 %v3349_v10, %v886_v3  ;;  %v893_v56 = vadd.f32 %v3350_v22, %v887_v15  ;;  %v3356_v15 = vld [vmem:[#allocation122_spill] sm:$0xff]  ;;  %v385_v10 = vpop.permute.xlu1 %384 }
 0x10f   : > { %v723_v60 = vadd.f32 %v721_v25, %v717_v12  ;;  %v2438_v42 = vadd.f32 %v531_v21, %v527_v48  ;;  %v2440_v18 = vadd.f32 %v532_v32, %v528_v47  ;;  %v3352_v23 = vstv %s3342_s7  ;;  %s2824_s7 = sld [smem:[#allocation3 + $0x5e]] }
 0x110   : > { %v724_v45 = vadd.f32 %v722_v17, %v718_v28  ;;  %v626_v13 = vmul.f32 %v3352_v23, %v2379_v11  ;;  %v3353_v9 = vmov %v3352_v23  ;;  %v803_v59 = vadd.f32 %v3354_v1, %v797_v14 }
 0x111   : > { %v627_v53 = vmul.f32 %v3353_v9, %v2386_v37  ;;  %v804_v3 = vadd.f32 %v2312_v49, %v798_v41  ;;  %v987_v8 = vadd.f32 %v3355_v63, %v981_v34  ;;  %v988_v19 = vadd.f32 %v3356_v15, %v982_v58 }
 0x112   : > { %v2452_v20 = vadd.f32 %v626_v13, %v622_v16  ;;  %v898_v50 = vadd.f32 %v3357_v30, %v892_v2  ;;  %v899_v62 = vadd.f32 %v2320_v5, %v893_v56  ;;  %v3358_v4 = vstv %s3351_s20  ;;  %v383_v2 = vpop.permute.xlu0 %382  ;;  %s1455_s20 = smov 126  }
 0x113   : > { %v2454_v21 = vadd.f32 %v627_v53, %v623_v36  ;;  %v807_v35 = vmul.f32 %v3358_v4, %v2379_v11  ;;  %v3359_v49 = vmov %v3358_v4  ;;  %v3360_v58 = vstv %s1746_s2  ;;  %s3364_s2 = sld [smem:[#allocation71_spill]] }
 0x114   : > { %v808_v34 = vmul.f32 %v3359_v49, %v2386_v37  ;;  %v902_v48 = vmul.f32 %v3360_v58, %v2379_v11  ;;  %v993_v38 = vadd.f32 %v2364_v51, %v987_v8  ;;  %v3361_v47 = vmov %v3360_v58 }
 0x115   : > { %v903_v46 = vmul.f32 %v3361_v47, %v2386_v37  ;;  %v994_v32 = vadd.f32 %v992_v40, %v988_v19  ;;  %v354_v5 = vsel %vm300_vm9, %v2333_v57, %v3362_v39  ;;  %v355_v12 = vsel %vm300_vm9, %v3362_v39, %v2333_v57 }
 0x116   : > { %v2479_v28 = vadd.f32 %v807_v35, %v803_v59  ;;  %v2481_v55 = vadd.f32 %v808_v34, %v804_v3  ;;  %v3363_v51 = vstv %s1754_s8  ;;  %v356_v31 = vsel %vm210_vm10, %v355_v12, 0.0  ;;  %s3370_s8 = sld [smem:[#allocation74_spill]] }
 0x117   : > { %v997_v40 = vmul.f32 %v3363_v51, %v2379_v11  ;;  %v2488_v17 = vadd.f32 %v902_v48, %v898_v50  ;;  %v2490_v6 = vadd.f32 %v903_v46, %v899_v62  ;;  %v3366_v57 = vmov %v3363_v51 }
 0x118   : > { %v998_v16 = vmul.f32 %v3366_v57, %v2386_v37  ;;  %v363_v36 = vsel %vm309_vm1, %v2369_v61, %v2371_v54  ;;  %v3368_v11 = vstv %s1772_s15  ;;  %v2509_v37 = vsel %vm309_vm1, %v2371_v54, %v2369_v61  ;;  %s3376_s15 = sld [smem:[#allocation54_spill]] }
 0x119   : > { %v2499_v29 = vadd.f32 %v997_v40, %v993_v38  ;;  %v727_v14 = vmul.f32 %v3368_v11, %v356_v31  ;;  %v3369_v26 = vmov %v3368_v11  ;;  %v3372_v56 = vstv %s1756_s16  ;;  %s3384_s16 = sld [smem:[#allocation56_spill]] }
 0x11a   : > { %v728_v41 = vmul.f32 %v3369_v26, %v354_v5  ;;  %v2511_v22 = vadd.f32 %v998_v16, %v994_v32  ;;  %v442_v23 = vmul.f32 %v3372_v56, %v356_v31  ;;  %v3374_v13 = vmov %v3372_v56  ;;  %v393_v56 = vpop.permute.xlu1 %392 }
 0x11b   : > { %v443_v9 = vmul.f32 %v3374_v13, %v354_v5  ;;  %v3375_v53 = vstv %s3364_s2  ;;  %v729_v54 = vadd.f32 %v727_v14, %v723_v60  ;;  %v2523_v8 = vsel %vm226_vm2, %v363_v36, 0.0  ;;  %s1456_s2 = smov 125  }
 0x11c   : > { %v537_v1 = vmul.f32 %v3375_v53, %v356_v31  ;;  %v3377_v59 = vmov %v3375_v53  ;;  %v730_v3 = vadd.f32 %v728_v41, %v724_v45  ;;  %v3380_v15 = vstv %s3367_s9  ;;  %s3484_s9 = sld [smem:[#allocation15_spill]] }
 0x11d   : > { %v538_v61 = vmul.f32 %v3377_v59, %v354_v5  ;;  %v632_v19 = vmul.f32 %v3380_v15, %v356_v31  ;;  %v3381_v30 = vmov %v3380_v15  ;;  %v3382_v62 = vstv %s1774_s28  ;;  %s3400_s28 = sld [smem:[#allocation80_spill]] }
 0x11e   : > { %v2529_v50 = vmul.f32 %v3381_v30, %v354_v5  ;;  %v2533_v4 = vmul.f32 %v3382_v62, %v356_v31  ;;  %v3383_v35 = vmov %v3382_v62  ;;  %v3385_v34 = vstv %s3370_s8  ;;  %s3485_s8 = sld [smem:[#allocation20_spill]] }
 0x11f   : > { %v2537_v49 = vmul.f32 %v3383_v35, %v354_v5  ;;  %v2541_v60 = vmul.f32 %v3385_v34, %v356_v31  ;;  %v3386_v45 = vmov %v3385_v34  ;;  %v3387_v48 = vstv %s3371_s3  ;;  %s3486_s3 = sld [smem:[#allocation21_spill]] }
 0x120   : > { %v2545_v58 = vmul.f32 %v3386_v45, %v354_v5  ;;  %v733_v38 = vmul.f32 %v3387_v48, %v2523_v8  ;;  %v3388_v47 = vmov %v3387_v48  ;;  %v3389_v32 = vstv %s3373_s6  ;;  %s3487_s6 = sld [smem:[#allocation18_spill]] }
 0x121   : > { %v734_v46 = vmul.f32 %v3388_v47, %v2509_v37  ;;  %v2555_v39 = vmul.f32 %v3389_v32, %v356_v31  ;;  %v3390_v12 = vmov %v3389_v32  ;;  %v3391_v40 = vstv %s3376_s15 }
 0x122   : > { %v2559_v51 = vmul.f32 %v3390_v12, %v354_v5  ;;  %v448_v25 = vmul.f32 %v3391_v40, %v2523_v8  ;;  %v3392_v57 = vmov %v3391_v40  ;;  %v3393_v36 = vstv %s3378_s14  ;;  %v391_v5 = vpop.permute.xlu0 %390  ;;  %s1271_s15 = sshll.u32 %s3484_s9, 7 }
 0x123   : > { %v449_v16 = vmul.f32 %v3392_v57, %v2509_v37  ;;  %v543_v11 = vmul.f32 %v3393_v36, %v2523_v8  ;;  %v3394_v14 = vmov %v3393_v36  ;;  %v2573_v41 = vadd.f32 %v733_v38, %v729_v54 }
 0x124   : > { %v544_v26 = vmul.f32 %v3394_v14, %v2509_v37  ;;  %v2575_v31 = vadd.f32 %v734_v46, %v730_v3  ;;  %v3395_v13 = vstv %s3384_s16  ;;  %v3397_v15 = vstv %s1808_s12  ;;  %s3414_s12 = sld [smem:[#allocation82_spill]]  ;;  %s3488_s14 = sshll.u32 %s3485_s8, 3 }
 0x125   : > { %v638_v53 = vmul.f32 %v3395_v13, %v2523_v8  ;;  %v3396_v59 = vmov %v3395_v13  ;;  %v2586_v30 = vmul.f32 %v3397_v15, %v2523_v8  ;;  %v371_v54 = vsel %vm318_vm3, %v2413_v44, %v2415_v52  ;;  %s137_s16 = scalar_lea.vmem [#allocation7], %s3488_s14 }
 0x126   : > { %v639_v63 = vmul.f32 %v3396_v59, %v2509_v37  ;;  %v3398_v3 = vmov %v3397_v15  ;;  %v3399_v35 = vstv %s1810_s17  ;;  %v2604_v45 = vsel %vm327_vm5, %v375_v24, %v377_v43  ;;  %s3405_s17 = sld [smem:[#allocation81_spill]]  ;;  %p3490_p0 = scmp.ne.s32.totalorder %s3487_s6, 0 }
 0x127   : > { %v2595_v62 = vmul.f32 %v3398_v3, %v2509_v37  ;;  %v2600_v34 = vmul.f32 %v3399_v35, %v2523_v8  ;;  %v379_v48 = vsel %vm327_vm5, %v377_v43, %v375_v24  ;;  %v2610_v47 = vsel %vm242_vm4, %v371_v54, 0.0 }
 0x128   : > { %v2614_v46 = vsel %vm336_vm7, %v383_v2, %v385_v10  ;;  %v387_v32 = vsel %vm336_vm7, %v385_v10, %v383_v2  ;;  %v395_v12 = vsel %vm345_vm11, %v393_v56, %v391_v5  ;;  %v3402_v40 = vmov %v3399_v35 }
 0x129   : > { %v2623_v43 = vmul.f32 %v3402_v40, %v2509_v37  ;;  %v2629_v24 = vsel %vm318_vm3, %v2415_v52, %v2413_v44  ;;  %v2633_v57 = vsel %vm345_vm11, %v391_v5, %v393_v56  ;;  %v444_v10 = vadd.f32 %v442_v23, %v2406_v27 }
 0x12a   : > { %v2638_v36 = vsel %vm261_vm6, %v379_v48, 0.0  ;;  %v2642_v13 = vsel %vm277_vm8, %v387_v32, 0.0  ;;  %v2646_v44 = vsel %vm293_vm12, %v395_v12, 0.0  ;;  %v445_v52 = vadd.f32 %v443_v9, %v2417_v0 }
 0x12b   : > { %v450_v56 = vadd.f32 %v448_v25, %v444_v10  ;;  %v3406_v5 = vstv %s1818_s10  ;;  %v3407_v23 = vstv %s3400_s28  ;;  %v3408_v15 = vstv %s1848_s21  ;;  %s3441_s10 = sld [smem:[#allocation93_spill]]  ;;  %s3451_s21 = sld [smem:[#allocation96_spill]] }
 0x12c   : > { %v454_v27 = vmul.f32 %v3406_v5, %v2610_v47  ;;  %v466_v59 = vmul.f32 %v3407_v23, %v2604_v45  ;;  %v472_v54 = vmul.f32 %v3408_v15, %v2614_v46  ;;  %v3409_v3 = vstv %s3190_s29  ;;  %s1451_s29 = smov 3   ;;  %s1089_s28 = sshll.u32 %s137_s16, 4  ;;  %s2885_s28 = int_to_ptr.vmem [resolvable:$true] %s1089_s28 }
 0x12d   : > { %v478_v7 = vmul.f32 %v3409_v3, %v2633_v57  ;;  %v451_v35 = vadd.f32 %v449_v16, %v445_v52  ;;  %v3410_v48 = vmov %v3406_v5  ;;  %v539_v9 = vadd.f32 %v537_v1, %v2438_v42  ;;  %v3416_v1 = vld [vmem:[#allocation97_spill] sm:$0xff] }
 0x12e   : > { %v455_v0 = vmul.f32 %v3410_v48, %v2629_v24  ;;  %v456_v25 = vadd.f32 %v454_v27, %v450_v56  ;;  %v3411_v38 = vmov %v3407_v23  ;;  %v3412_v12 = vmov %v3408_v15 }
 0x12f   : > { %v467_v32 = vmul.f32 %v3411_v38, %v2638_v36  ;;  %v473_v40 = vmul.f32 %v3412_v12, %v2642_v13  ;;  %v3413_v10 = vmov %v3409_v3  ;;  %v545_v16 = vadd.f32 %v543_v11, %v539_v9 }
 0x130   : > { %v479_v2 = vmul.f32 %v3413_v10, %v2646_v44  ;;  %v457_v14 = vadd.f32 %v455_v0, %v451_v35  ;;  %v3415_v52 = vstv %s3405_s17  ;;  %v540_v42 = vadd.f32 %v538_v61, %v2440_v18  ;;  %v3420_v35 = vld [vmem:[#allocation99_spill] sm:$0xff] }
 0x131   : > { %v549_v5 = vmul.f32 %v3415_v52, %v2610_v47  ;;  %v462_v56 = vadd.f32 %v3416_v1, %v456_v25  ;;  %v3417_v27 = vstv %s1850_s0  ;;  %v3418_v15 = vstv %s1864_s5  ;;  %s2771_s0 = sld [smem:[#allocation3 + $0x42]] }
 0x132   : > { %v561_v23 = vmul.f32 %v3417_v27, %v2604_v45  ;;  %v567_v3 = vmul.f32 %v3418_v15, %v2614_v46  ;;  %v3419_v48 = vmov %v3415_v52  ;;  %v463_v11 = vadd.f32 %v3420_v35, %v457_v14 }
 0x133   : > { %v550_v38 = vmul.f32 %v3419_v48, %v2629_v24  ;;  %v551_v0 = vadd.f32 %v549_v5, %v545_v16  ;;  %v546_v9 = vadd.f32 %v544_v26, %v540_v42  ;;  %v634_v12 = vadd.f32 %v632_v19, %v2452_v20  ;;  %v3424_v48 = vld [vmem:[#allocation100_spill] sm:$0xff] }
 0x134   : > { %v468_v18 = vadd.f32 %v466_v59, %v462_v56  ;;  %v3421_v61 = vstv %s3193_s27  ;;  %v3422_v10 = vmov %v3417_v27  ;;  %v3423_v1 = vstv %s3414_s12  ;;  %s3431_s27 = sld [smem:[#allocation79_spill]] }
 0x135   : > { %v573_v25 = vmul.f32 %v3421_v61, %v2633_v57  ;;  %v562_v52 = vmul.f32 %v3422_v10, %v2638_v36  ;;  %v644_v27 = vmul.f32 %v3423_v1, %v2610_v47  ;;  %v469_v15 = vadd.f32 %v467_v32, %v463_v11 }
 0x136   : > { %v557_v33 = vadd.f32 %v3424_v48, %v551_v0  ;;  %v552_v14 = vadd.f32 %v550_v38, %v546_v9  ;;  %v640_v16 = vadd.f32 %v638_v53, %v634_v12  ;;  %v474_v26 = vadd.f32 %v472_v54, %v468_v18 }
 0x137   : > { %v3425_v20 = vstv %s1864_s5  ;;  %v3426_v59 = vmov %v3421_v61  ;;  %v635_v42 = vadd.f32 %v2529_v50, %v2454_v21  ;;  %v475_v56 = vadd.f32 %v473_v40, %v469_v15  ;;  %v3427_v61 = vld [vmem:[#allocation102_spill] sm:$0xff]  ;;  %v3430_v21 = vld [vmem:[#allocation103_spill] sm:$0xff]  ;;  %s3450_s5 = sld [smem:[#allocation95_spill]] }
 0x138   : > { %v568_v19 = vmul.f32 %v3425_v20, %v2642_v13  ;;  %v574_v5 = vmul.f32 %v3426_v59, %v2646_v44  ;;  %v563_v35 = vadd.f32 %v561_v23, %v557_v33  ;;  %v558_v32 = vadd.f32 %v3427_v61, %v552_v14 }
 0x139   : > { %v646_v11 = vadd.f32 %v644_v27, %v640_v16  ;;  %v480_v0 = vadd.f32 %v478_v7, %v474_v26  ;;  %v3428_v53 = vstv %s3187_s30  ;;  %v641_v38 = vadd.f32 %v639_v63, %v635_v42  ;;  %v3436_v26 = vld [vmem:[#allocation104_spill] sm:$0xff]  ;;  %s3440_s30 = sld [smem:[#allocation85_spill]] }
 0x13a   : > { %v656_v54 = vmul.f32 %v3428_v53, %v2604_v45  ;;  %v3429_v9 = vmov %v3423_v1  ;;  %v481_v18 = vadd.f32 %v479_v2, %v475_v56  ;;  %v569_v10 = vadd.f32 %v567_v3, %v563_v35 }
 0x13b   : > { %v645_v12 = vmul.f32 %v3429_v9, %v2629_v24  ;;  %v564_v1 = vadd.f32 %v562_v52, %v558_v32  ;;  %v652_v50 = vadd.f32 %v3430_v21, %v646_v11  ;;  %482 = vrot.lane.b32.xlu0 %v480_v0, %s1451_s29  ;;  %v3432_v33 = vstv %s1904_s23  ;;  %s1452_s23 = smov 2  }
 0x13c   : > { %v662_v7 = vmul.f32 %v3432_v33, %v2614_v46  ;;  %v3433_v40 = vstv %s1919_s11  ;;  %v815_v27 = vadd.f32 %v2533_v4, %v2479_v28  ;;  %484 = vrot.lane.b32.xlu1 %v481_v18, %s1451_s29  ;;  %v3434_v52 = vmov %v3428_v53  ;;  %s1453_s11 = smov 1  }
 0x13d   : > { %v668_v23 = vmul.f32 %v3433_v40, %v2633_v57  ;;  %v647_v63 = vadd.f32 %v645_v12, %v641_v38  ;;  %v570_v2 = vadd.f32 %v568_v19, %v564_v1  ;;  %v658_v3 = vadd.f32 %v656_v54, %v652_v50  ;;  %v3445_v12 = vld [vmem:[#allocation105_spill] sm:$0xff] }
 0x13e   : > { %v657_v15 = vmul.f32 %v3434_v52, %v2638_v36  ;;  %v3435_v48 = vmov %v3432_v33  ;;  %v575_v16 = vadd.f32 %v573_v25, %v569_v10  ;;  %v821_v59 = vadd.f32 %v2586_v30, %v815_v27 }
 0x13f   : > { %v663_v14 = vmul.f32 %v3435_v48, %v2642_v13  ;;  %v653_v20 = vadd.f32 %v3436_v26, %v647_v63  ;;  %v3437_v42 = vstv %s3192_s24  ;;  %v3438_v4 = vstv %s3431_s27  ;;  %s3455_s24 = sld [smem:[#allocation94_spill]]  ;;  %s3489_s27 = sld [smem:[#allocation132_spill]] }
 0x140   : > { %v825_v28 = vmul.f32 %v3437_v42, %v2610_v47  ;;  %v1009_v19 = vmul.f32 %v3438_v4, %v2523_v8  ;;  %v576_v56 = vadd.f32 %v574_v5, %v570_v2  ;;  %v664_v35 = vadd.f32 %v662_v7, %v658_v3  ;;  %577 = vrot.lane.b32.xlu0 %v575_v16, %s1452_s23  ;;  %v3452_v2 = vld [vmem:[#allocation106_spill] sm:$0xff] }
 0x141   : > { %v816_v61 = vadd.f32 %v2537_v49, %v2481_v55  ;;  %v3439_v32 = vmov %v3438_v4  ;;  %v659_v30 = vadd.f32 %v657_v15, %v653_v20  ;;  %v3442_v11 = vmov %v3433_v40 }
 0x142   : > { %v1010_v25 = vmul.f32 %v3439_v32, %v2509_v37  ;;  %v669_v0 = vmul.f32 %v3442_v11, %v2646_v44  ;;  %v827_v53 = vadd.f32 %v825_v28, %v821_v59  ;;  %579 = vrot.lane.b32.xlu1 %v576_v56, %s1452_s23  ;;  %v3443_v8 = vstv %s1912_s19  ;;  %s3456_s19 = sld [smem:[#allocation89_spill]]  ;;  %s1373_s23 = scalar_lea.vmem %s2885_s28, 128 }
 0x143   : > { %v837_v5 = vmul.f32 %v3443_v8, %v2604_v45  ;;  %v822_v54 = vadd.f32 %v2595_v62, %v816_v61  ;;  %v3444_v55 = vmov %v3437_v42  ;;  %v910_v37 = vadd.f32 %v2541_v60, %v2488_v17  ;;  %v3458_v42 = vld [vmem:[#allocation107_spill] sm:$0xff]  ;;  %p1374_p9 = scmp.ne.s32.totalorder %s2885_s28, %s1373_s23 }
 0x144   : > { %v826_v49 = vmul.f32 %v3444_v55, %v2629_v24  ;;  %v670_v38 = vadd.f32 %v668_v23, %v664_v35  ;;  %v665_v9 = vadd.f32 %v663_v14, %v659_v30  ;;  %v833_v18 = vadd.f32 %v3445_v12, %v827_v53 }
 0x145   : > { %v3446_v10 = vstv %s1928_s18  ;;  %v3447_v21 = vstv %s3440_s30  ;;  %v916_v62 = vadd.f32 %v2600_v34, %v910_v37  ;;  %v3448_v7 = vstv %s3441_s10  ;;  %s3463_s18 = sld [smem:[#allocation86_spill]]  ;;  %s2883_s29 = scalar_lea.hbm %s3489_s27, %s1271_s15 }
 0x146   : > { %v843_v1 = vmul.f32 %v3446_v10, %v2614_v46  ;;  %v849_v50 = vmul.f32 %v3447_v21, %v2633_v57  ;;  %v828_v33 = vadd.f32 %v826_v49, %v822_v54  ;;  %v920_v40 = vmul.f32 %v3448_v7, %v2610_v47  ;;  %672 = vrot.lane.b32.xlu0 %v670_v38, %s1453_s11  ;;  %v3464_v54 = vld [vmem:[#allocation108_spill] sm:$0xff]  ;;  %s1075_s30 = scalar_lea.sflag [#allocation6], %s3485_s8  ;;  %p1375_p1 = pnand %p1374_p9, %p3490_p0 }
 0x147   : > { %v671_v17 = vadd.f32 %v669_v0, %v665_v9  ;;  %v839_v60 = vadd.f32 %v837_v5, %v833_v18  ;;  %v3449_v23 = vmov %v3443_v8  ;;  %v911_v27 = vadd.f32 %v2545_v58, %v2490_v6  ;;  %s1457_s10 = smov [#allocation7]  }
 0x148   : > { %v838_v63 = vmul.f32 %v3449_v23, %v2638_v36  ;;  %v834_v34 = vadd.f32 %v3452_v2, %v828_v33  ;;  %v3453_v3 = vmov %v3446_v10  ;;  %v3454_v15 = vmov %v3447_v21  ;;  %v3471_v33 = vld [vmem:[#allocation109_spill] sm:$0xff]  ;;  %p1376_p2 = pneg %p1375_p1 }
 0x149   : > { %v844_v52 = vmul.f32 %v3453_v3, %v2642_v13  ;;  %v850_v48 = vmul.f32 %v3454_v15, %v2646_v44  ;;  %v922_v14 = vadd.f32 %v920_v40, %v916_v62  ;;  %674 = vrot.lane.b32.xlu1 %v671_v17, %s1453_s11  ;;  %v845_v16 = vadd.f32 %v843_v1, %v839_v60  ;;  %v3475_v15 = vld [vmem:[#allocation110_spill] sm:$0xff]  ;;  %s1377_s11 = sshll.u32 %s1457_s10, 4  ;;  %s1378_s11 = int_to_ptr.vmem [resolvable:$false] %s1377_s11 }
 0x14a   : > { %v917_v26 = vadd.f32 %v2623_v43, %v911_v27  ;;  %v3457_v6 = vmov %v3448_v7  ;;  %v1005_v20 = vadd.f32 %v2555_v39, %v2499_v29  ;;  %v840_v59 = vadd.f32 %v838_v63, %v834_v34  ;;  %p1380_p10 = scmp.lt.s32.totalorder %s2885_s28, %s1378_s11 }
 0x14b   : > { %v921_v58 = vmul.f32 %v3457_v6, %v2629_v24  ;;  %v928_v28 = vadd.f32 %v3458_v42, %v922_v14  ;;  %v3459_v4 = vstv %s3450_s5  ;;  %v3460_v35 = vstv %s3451_s21  ;;  %s1379_s5 = scalar_lea.vmem %s1378_s11, 256 }
 0x14c   : > { %v932_v56 = vmul.f32 %v3459_v4, %v2604_v45  ;;  %v938_v61 = vmul.f32 %v3460_v35, %v2614_v46  ;;  %v851_v32 = vadd.f32 %v849_v50, %v845_v16  ;;  %v1011_v43 = vadd.f32 %v1009_v19, %v1005_v20  ;;  %p1381_p13 = scmp.lt.s32.totalorder %s1379_s5, %s1373_s23 }
 0x14d   : > { %v923_v30 = vadd.f32 %v921_v58, %v917_v26  ;;  %v3461_v11 = vstv %s3455_s24  ;;  %v846_v53 = vadd.f32 %v844_v52, %v840_v59  ;;  %v3462_v39 = vstv %s3456_s19 }
 0x14e   : > { %v1015_v0 = vmul.f32 %v3461_v11, %v2610_v47  ;;  %v934_v29 = vadd.f32 %v932_v56, %v928_v28  ;;  %v944_v8 = vmul.f32 %v3462_v39, %v2633_v57  ;;  %v1006_v5 = vadd.f32 %v2559_v51, %v2511_v22  ;;  %853 = vrot.lane.b32.xlu0 %v851_v32, %s1454_s13  ;;  %v3479_v56 = vld [vmem:[#allocation23_spill] sm:$0xff]  ;;  %p1382_p5 = por %p1381_p13, %p1380_p10 }
 0x14f   : > { %v929_v55 = vadd.f32 %v3464_v54, %v923_v30  ;;  %v3465_v19 = vmov %v3459_v4  ;;  %v3466_v37 = vmov %v3460_v35  ;;  %v852_v12 = vadd.f32 %v850_v48, %v846_v53  ;;  %v3480_v30 = vld [vmem:[#allocation22_spill] sm:$0xff] }
 0x150   : > { %v933_v49 = vmul.f32 %v3465_v19, %v2638_v36  ;;  %v939_v38 = vmul.f32 %v3466_v37, %v2642_v13  ;;  %v1017_v9 = vadd.f32 %v1015_v0, %v1011_v43  ;;  %v940_v18 = vadd.f32 %v938_v61, %v934_v29  ;;  %p1383_p7 = pnand %p1382_p5, %p1376_p2 }
 0x151   : > { %v1012_v22 = vadd.f32 %v1010_v25, %v1006_v5  ;;  %v3468_v51 = vmov %v3461_v11  ;;  %v3470_v21 = vmov %v3462_v39  ;;  %v3472_v7 = vstv %s3463_s18  ;;  %855 = vrot.lane.b32.xlu1 %v852_v12, %s1454_s13 }
 0x152   : > { %v1016_v10 = vmul.f32 %v3468_v51, %v2629_v24  ;;  %v935_v1 = vadd.f32 %v933_v49, %v929_v55  ;;  %v945_v50 = vmul.f32 %v3470_v21, %v2646_v44  ;;  %v1023_v62 = vadd.f32 %v3471_v33, %v1017_v9  ;;  %v3481_v51 = vld [vmem:[#allocation66_spill] sm:$0xff]  ;;  %v3482_v21 = vld [vmem:[#allocation59_spill] sm:$0xff] }
 0x153   : > { %v1027_v40 = vmul.f32 %v3472_v7, %v2604_v45  ;;  %v738_v25 = vstv %s2771_s0  ;;  %v946_v17 = vadd.f32 %v944_v8, %v940_v18  ;;  %v744_v23 = vstv %s2780_s4 }
 0x154   : > { %v1018_v60 = vadd.f32 %v1016_v10, %v1012_v22  ;;  %v941_v63 = vadd.f32 %v939_v38, %v935_v1  ;;  %v3473_v2 = vstv %s3467_s25  ;;  %v3474_v3 = vstv %s3469_s1 }
 0x155   : > { %v1029_v27 = vadd.f32 %v1027_v40, %v1023_v62  ;;  %v1033_v34 = vmul.f32 %v3473_v2, %v2614_v46  ;;  %v1039_v52 = vmul.f32 %v3474_v3, %v2633_v57  ;;  %948 = vrot.lane.b32.xlu0 %v946_v17, %s1455_s20  ;;  %v3476_v14 = vmov %v3472_v7 }
 0x156   : > { %v1024_v48 = vadd.f32 %v3475_v15, %v1018_v60  ;;  %v1028_v16 = vmul.f32 %v3476_v14, %v2638_v36  ;;  %v3477_v26 = vmov %v3473_v2  ;;  %v947_v58 = vadd.f32 %v945_v50, %v941_v63 }
 0x157   : > { %v1034_v6 = vmul.f32 %v3477_v26, %v2642_v13  ;;  %v1035_v20 = vadd.f32 %v1033_v34, %v1029_v27  ;;  %v739_v59 = vmul.f32 %v738_v25, %v2610_v47  ;;  %v3478_v28 = vmov %v3474_v3 }
 0x158   : > { %v1030_v42 = vadd.f32 %v1028_v16, %v1024_v48  ;;  %v1040_v4 = vmul.f32 %v3478_v28, %v2646_v44  ;;  %v745_v35 = vmul.f32 %v744_v23, %v3479_v56  ;;  %v740_v61 = vmul.f32 %v738_v25, %v2629_v24  ;;  %950 = vrot.lane.b32.xlu1 %v947_v58, %s1455_s20 }
 0x159   : > { %v1041_v32 = vadd.f32 %v1039_v52, %v1035_v20  ;;  %v746_v43 = vmul.f32 %v744_v23, %v3480_v30  ;;  %v750_v11 = vstv %s2810_s22  ;;  %v741_v53 = vadd.f32 %v739_v59, %v2573_v41 }
 0x15a   : > { %v1036_v0 = vadd.f32 %v1034_v6, %v1030_v42  ;;  %v756_v29 = vstv %s2815_s26  ;;  %v742_v47 = vadd.f32 %v740_v61, %v2575_v31  ;;  %v762_v39 = vstv %s2824_s7 }
 0x15b   : > { %1043 = vrot.lane.b32.xlu0 %v1041_v32, %s1456_s2  ;;  %v747_v5 = vadd.f32 %v745_v35, %v741_v53  ;;  %v751_v54 = vmul.f32 %v750_v11, %v2604_v45  ;;  %v752_v24 = vmul.f32 %v750_v11, %v2638_v36  ;;  %v758_v19 = vmul.f32 %v756_v29, %v2642_v13 }
 0x15c   : > { %v1042_v8 = vadd.f32 %v1040_v4, %v1036_v0  ;;  %v748_v55 = vadd.f32 %v746_v43, %v742_v47  ;;  %v757_v37 = vmul.f32 %v756_v29, %v2614_v46  ;;  %v763_v41 = vmul.f32 %v762_v39, %v2633_v57 }
 0x15d   : > { %v753_v49 = vadd.f32 %v751_v54, %v747_v5  ;;  %v764_v9 = vmul.f32 %v762_v39, %v2646_v44  ;;  %v187_v45 = vand.u32 15, %v3481_v51  ;;  %v180_v13 = vand.u32 15, %v3482_v21 }
 0x15e   : > { %1045 = vrot.lane.b32.xlu1 %v1042_v8, %s1456_s2  ;;  %v754_v38 = vadd.f32 %v752_v24, %v748_v55  ;;  %vm581_vm13 = vcmp.lt.s32.totalorder %v3482_v21, 2  ;;  %vm486_vm14 = vcmp.lt.s32.totalorder %v3482_v21, 3  ;;  %vm676_vm1 = vcmp.lt.s32.totalorder %v3482_v21, 1 }
 0x15f   : > { %v759_v31 = vadd.f32 %v757_v37, %v753_v49  ;;  %v217_v36 = vadd.s32 4294967294, %v187_v45  ;;  %v201_v50 = vadd.s32 4294967293, %v187_v45  ;;  %v233_v44 = vadd.s32 4294967295, %v187_v45 }
 0x160   : > { %v760_v12 = vadd.f32 %v758_v19, %v754_v38  ;;  %v216_v33 = vadd.s32 4294967294, %v180_v13  ;;  %v200_v7 = vadd.s32 4294967293, %v180_v13  ;;  %v232_v60 = vadd.s32 4294967295, %v180_v13 }
 0x161   : > { %v765_v18 = vadd.f32 %v763_v41, %v759_v31  ;;  %vm219_vm15 = vcmp.ge.s32.totalorder %v217_v36, 0  ;;  %vm203_vm0 = vcmp.ge.s32.totalorder %v201_v50, 0  ;;  %vm235_vm2 = vcmp.ge.s32.totalorder %v233_v44, 0  ;;  %v1332_v44 = vld [vmem:[%s3486_s3] sm:$0xff] }
 0x162   : > { %v766_v22 = vadd.f32 %v764_v9, %v760_v12  ;;  %vm218_vm3 = vcmp.ge.s32.totalorder %v216_v33, 0  ;;  %vm202_vm4 = vcmp.ge.s32.totalorder %v200_v7, 0  ;;  %v249_v3 = vadd.s32 1, %v187_v45 }
 0x163   : > { %vm234_vm5 = vcmp.ge.s32.totalorder %v232_v60, 0  ;;  %vm857_vm6 = vcmp.lt.s32.totalorder %v3482_v21, 127  ;;  %v248_v42 = vadd.s32 1, %v180_v13  ;;  %v265_v4 = vadd.s32 2, %v187_v45 }
 0x164   : > { %vm253_vm7 = vcmp.lt.s32.totalorder %v249_v3, 16  ;;  %v264_v61 = vadd.s32 2, %v180_v13  ;;  %vm952_vm9 = vcmp.lt.s32.totalorder %v3482_v21, 126  ;;  %v280_v29 = vadd.s32 3, %v180_v13 }
 0x165   : > { %vm252_vm8 = vcmp.lt.s32.totalorder %v248_v42, 16  ;;  %vm269_vm10 = vcmp.lt.s32.totalorder %v265_v4, 16  ;;  %v281_v47 = vadd.s32 3, %v187_v45  ;;  %vm1047_vm12 = vcmp.lt.s32.totalorder %v3482_v21, 125 }
 0x166   : > { %vm268_vm11 = vcmp.lt.s32.totalorder %v264_v61, 16  ;;  %v3483_v37 = vlaneseq }
 0x168   : > { %v1061_v41 = vshrl.u32 %v3483_v37, 7 }
 0x1ad   : > { %v483_v10 = vpop.permute.xlu0 %482 }
 0x1ae   : > { %v485_v1 = vpop.permute.xlu1 %484 }
 0x1af   : > { %v487_v40 = vsel %vm486_vm14, %v483_v10, %v485_v1  ;;  %v488_v52 = vsel %vm486_vm14, %v485_v1, %v483_v10  ;;  %vm285_vm14 = vcmp.lt.s32.totalorder %v281_v47, 16  ;;  %v1062_v10 = vsub.s32 0, %v1061_v41 }
 0x1b0   : > { %v490_v23 = vsel %vm203_vm0, %v487_v40, 0.0  ;;  %v489_v6 = vsel %vm202_vm4, %v488_v52, 0.0 }
 0x1b2   : > { %v578_v46 = vpop.permute.xlu0 %577 }
 0x1b4   : > { %v580_v57 = vpop.permute.xlu1 %579 }
 0x1b5   : > { %v582_v62 = vsel %vm581_vm13, %v578_v46, %v580_v57  ;;  %v583_v63 = vsel %vm581_vm13, %v580_v57, %v578_v46  ;;  %vm284_vm13 = vcmp.lt.s32.totalorder %v280_v29, 16 }
 0x1b6   : > { %v585_v25 = vsel %vm219_vm15, %v582_v62, 0.0  ;;  %v584_v14 = vsel %vm218_vm3, %v583_v63, 0.0 }
 0x1b7   : > { %v587_v2 = vadd.f32 %v585_v25, %v490_v23  ;;  %v586_v59 = vadd.f32 %v584_v14, %v489_v6 }
 0x1b8   : > { %v673_v17 = vpop.permute.xlu0 %672 }
 0x1bb   : > { %v675_v27 = vpop.permute.xlu1 %674 }
 0x1bc   : > { %v677_v34 = vsel %vm676_vm1, %v673_v17, %v675_v27  ;;  %v678_v15 = vsel %vm676_vm1, %v675_v27, %v673_v17 }
 0x1bd   : > { %v680_v48 = vsel %vm235_vm2, %v677_v34, 0.0  ;;  %v679_v58 = vsel %vm234_vm5, %v678_v15, 0.0 }
 0x1be   : > { %v682_v16 = vadd.f32 %v680_v48, %v587_v2  ;;  %v681_v56 = vadd.f32 %v679_v58, %v586_v59 }
 0x1c0   : > { %v854_v26 = vpop.permute.xlu0 %853  ;;  %v768_v20 = vadd.f32 %v766_v22, %v682_v16  ;;  %v767_v0 = vadd.f32 %v765_v18, %v681_v56 }
 0x1c3   : > { %v856_v28 = vpop.permute.xlu1 %855 }
 0x1c4   : > { %v859_v35 = vsel %vm857_vm6, %v856_v28, %v854_v26  ;;  %v858_v43 = vsel %vm857_vm6, %v854_v26, %v856_v28 }
 0x1c5   : > { %v861_v32 = vsel %vm253_vm7, %v859_v35, 0.0  ;;  %v860_v39 = vsel %vm252_vm8, %v858_v43, 0.0 }
 0x1c6   : > { %v863_v11 = vadd.f32 %v861_v32, %v768_v20  ;;  %v862_v49 = vadd.f32 %v860_v39, %v767_v0 }
 0x1c7   : > { %v949_v30 = vpop.permute.xlu0 %948 }
 0x1ca   : > { %v951_v53 = vpop.permute.xlu1 %950 }
 0x1cb   : > { %v953_v8 = vsel %vm952_vm9, %v949_v30, %v951_v53  ;;  %v954_v5 = vsel %vm952_vm9, %v951_v53, %v949_v30 }
 0x1cc   : > { %v956_v54 = vsel %vm269_vm10, %v954_v5, 0.0  ;;  %v955_v55 = vsel %vm268_vm11, %v953_v8, 0.0 }
 0x1cd   : > { %v958_v24 = vadd.f32 %v956_v54, %v863_v11  ;;  %v1044_v19 = vpop.permute.xlu0 %1043  ;;  %v957_v9 = vadd.f32 %v955_v55, %v862_v49 }
 0x1d0   : > { %v1046_v38 = vpop.permute.xlu1 %1045 }
 0x1d1   : > { %v1048_v31 = vsel %vm1047_vm12, %v1044_v19, %v1046_v38  ;;  %v1049_v12 = vsel %vm1047_vm12, %v1046_v38, %v1044_v19 }
 0x1d2   : > { %v1050_v18 = vsel %vm284_vm13, %v1048_v31, 0.0  ;;  %v1051_v22 = vsel %vm285_vm14, %v1049_v12, 0.0 }
 0x1d3   : > { %v1052_v51 = vadd.f32 %v1050_v18, %v957_v9  ;;  %v1053_v45 = vadd.f32 %v1051_v22, %v958_v24 }
 0x1d5   : > { %vm1054_vm15 = vcmp.gt.f32.partialorder %v1052_v51, 0.0  ;;  %vm1055_vm0 = vcmp.gt.f32.partialorder %v1053_v45, 0.0  ;;  %v1056_v1 = vmul.f32 0.01, %v1052_v51  ;;  %v1057_v36 = vmul.f32 0.01, %v1053_v45 }
 0x1d7   : > { %v1058_v21 = vsel %vm1054_vm15, %v1052_v51, %v1056_v1  ;;  %v1059_v13 = vsel %vm1055_vm0, %v1053_v45, %v1057_v36 }
 0x1d8   : > { %v1063_v50 = vrot.slane %v1058_v21, %v1062_v10  ;;  %v1067_v46 = vrot.slane %v1059_v13, %v1062_v10 }
 0x1da   : > { %v1070_v57 = vcombine.low %v1063_v50, %v1067_v46 }
 0x1dc   : > { %v1072_v33 = vmul.f32 %v1332_v44, %v1070_v57 }
 0x1de   : > { %1073 = vst [vmem:[%s137_s16] sm:$0xff] %v1072_v33 }
 0x1df   : > { %1386 = shalt.err (!%p1383_p7)
}
 0x1e0   : > { %s1387_s21 = scalar_lea.hbm %s2883_s29, 128  ;;  %s1391_s4 = scalar_lea.hbm %s3489_s27, 256 }
 0x1e1   : > { %p1388_p8 = scmp.ne.s32.totalorder %s2883_s29, %s1387_s21  ;;  %p1392_p3 = scmp.lt.u32.totalorder %s2883_s29, %s3489_s27 }
 0x1e2   : > { %p1393_p4 = scmp.lt.u32.totalorder %s1391_s4, %s1387_s21  ;;  %p1395_p9 = scmp.lt.u32.totalorder %s1387_s21, %s2883_s29 }
 0x1e3   : > { %p1389_p11 = pnand %p1388_p8, %p3490_p0 }
 0x1e4   : > { %p1394_p6 = por %p1393_p4, %p1392_p3 }
 0x1e5   : > { %p1390_p12 = pneg %p1389_p11 }
 0x1e6   : > { %p1396_p1 = por %p1395_p9, %p1394_p6 }
 0x1e8   : > { %p1397_p2 = pnand %p1396_p1, %p1390_p12 }
 0x1ea   : > { %1400 = shalt.err (!%p1397_p2)
}
 0x1eb   : > { %1274 = dma.vmem_to_hbm [thread:$0]  (%p3490_p0), %s2885_s28, 128, %s2883_s29, %s1075_s30  }
 0x1ec PF: > { %s3491_s13 = sld [smem:[#allocation11_spill]]  ;;  %s3492_s22 = sld [smem:[#allocation19_spill]] }
 0x1ed   : > { %s3493_s25 = sld [smem:[#allocation14_spill]] }
 0x1f2   : > { %s1101_s1 = sand.u32 1, %s3491_s13   ;;  %p3494_p10 = scmp.ne.s32.totalorder %s3492_s22, 0 }
 0x1f3   : > { %p3495_p13 = scmp.ge.s32.totalorder %s3493_s25, 2  ;;  %s1102_s26 = scalar_lea.sflag [#allocation6], %s1101_s1 }
 0x1f5   : > { %p1281_p5 = pnand %p3495_p13, %p3494_p10 }
 0x1f7   : > { %1424 = dma.done.wait (!%p1281_p5), %s1102_s26, 128  }
 0x1f8   : > { %1426 = vsyncadd (!%p1281_p5), %s1102_s26, 4294967168  ;;  %s3496_s22 = sld [smem:[#allocation16_spill]]  ;;  %s3497_s19 = sld [smem:[#allocation12_spill]] }
 0x1f9   : > { %s3498_s20 = sld [smem:[#allocation13_spill]]  ;;  %s3499_s21 = sld [smem:[#allocation17_spill]] }
 0x1fe   : > { %p19_p7 = scmp.ge.s32.totalorder %s3496_s22, 4  }
 0x200   :  { %21 = sbr.rel (!%p19_p7) target bundleno = 18 (0x12), region = 69 }
 0x207   :  { %1107 = vsyncpa [#allocation5], 1 }
 0x208   :  { %1109 = vsyncpa [#allocation5 + $0x1], 1 }
 0x209   :  { %1110 = vsyncpa [#allocation6], 1 }
 0x20a   :  { %1112 = vsyncpa [#allocation6 + $0x1], 1 }

</bundles_post_ra>
